<compile_context>
chip_gen: v7x
topology: tpu7x:2x2x1
jax: 0.10.0
libtpu: 0.0.40
codegen_flags: <defaults>
</compile_context>

<pallas_src>
import functools

import jax
import jax.numpy as jnp
from jax import lax
from jax.experimental import pallas as pl
from jax.experimental.pallas import tpu as pltpu

LEAKY_SLOPE = 0.01  # nn.LeakyReLU() default negative_slope


def _pad8(n):
    return (n + 7) // 8 * 8


def _lrelu(v):
    # max(v, a*v) == LeakyReLU(v) for 0 < a < 1; identical numerics, cheaper on VALU.
    return jnp.maximum(v, LEAKY_SLOPE * v)


# ---------------------------------------------------------------------------
# Kernel.  x arrives in native (TILE_B, d_in) layout; internally activations are
# kept transposed (features, TILE_B) so elementwise work is lane-dense; results
# are transposed back right before the store (narrow stores cost less than the
# extra wrapper-side HBM transpose pass they replace).
#
# Weight slab row layout (all offsets 8-aligned, in-dim on lanes from col 0):
#   [ 0:16]  W1^T (16, d_in)        [16:24]  W2^T (8, 16)
#   [24:32]  W3a^T (8, 8)  (res2)   [32:40]  W3b^T (8, 16) (res1)
#   [40:56]  W4^T (16, 8)
#   [56:72]  W5a^T (16, 16) (res3)  [72:88]  W5b^T (16, 8) (latent)
#   [88:88+d_out]            W6a^T (d_out, 16) (res4)
#   [88+pad8(d_out): +d_out] W6b^T (d_out, 8)  (latent)
# Bias slab (rows, 1): b1@0, b2@16, b3@24, b4@32, b5@48, b6@64.
# ---------------------------------------------------------------------------
def autoencoder_kernel(x_ref, w_ref, b_ref, out_ref, lat_ref, *, d_in, d_out):
    pd_out = _pad8(d_out)
    f32 = jnp.float32
    x = x_ref[...]                                             # (TILE_B, d_in)

    # efc1: contract the shared d_in axis of W1^T (16, d_in) and x (TILE_B, d_in)
    # -> (16, TILE_B); no wrapper- or kernel-side transpose of x needed.
    r1 = _lrelu(
        lax.dot_general(w_ref[0:16, 0:d_in], x, (((1,), (1,)), ((), ())),
                        preferred_element_type=f32)
        + b_ref[0:16, :])                                      # (16, TB)
    # efc2
    r2 = _lrelu(jnp.dot(w_ref[16:24, 0:16], r1, preferred_element_type=f32)
                + b_ref[16:24, :])                             # (8, TB)
    # efc3 on cat(res2, res1) -> split matmul (weights pre-split in the slab)
    lat = _lrelu(jnp.dot(w_ref[24:32, 0:8], r2, preferred_element_type=f32)
                 + jnp.dot(w_ref[32:40, 0:16], r1, preferred_element_type=f32)
                 + b_ref[24:32, :])                            # (8, TB)
    # dfc1
    r3 = _lrelu(jnp.dot(w_ref[40:56, 0:8], lat, preferred_element_type=f32)
                + b_ref[32:48, :])                             # (16, TB)
    # dfc2 on cat(res3, latent)
    r4 = _lrelu(jnp.dot(w_ref[56:72, 0:16], r3, preferred_element_type=f32)
                + jnp.dot(w_ref[72:88, 0:8], lat, preferred_element_type=f32)
                + b_ref[48:64, :])                             # (16, TB)
    # dfc3 on cat(res4, latent); no activation
    outT = (jnp.dot(w_ref[88:88 + d_out, 0:16], r4, preferred_element_type=f32)
            + jnp.dot(w_ref[88 + pd_out:88 + pd_out + d_out, 0:8], lat,
                      preferred_element_type=f32)
            + b_ref[64:64 + d_out, :])                         # (d_out, TB)

    # In-kernel transpose back to the module's (batch, features) convention.
    out_ref[...] = outT.T.astype(out_ref.dtype)                # (TB, d_out)
    lat_ref[...] = lat.T.astype(lat_ref.dtype)                 # (TB, 8)


# ---------------------------------------------------------------------------
# Parameter packing: PyTorch-convention params (stored here as (in, out) weights,
# (1, out) biases) -> one (rows, 128) weight slab + one (rows, 1) bias slab.
# ---------------------------------------------------------------------------
def pack_params(params, d_in, d_out):
    assert d_in <= 128 and d_out <= 128, "packed slab assumes feature dims <= 128"
    pd_out = _pad8(d_out)
    w_rows = 88 + 2 * pd_out
    b_rows = _pad8(64 + d_out)

    w_slab = jnp.zeros((w_rows, 128), jnp.float32)

    def put_w(slab, row, w_t):  # w_t: (out, in)
        o, i = w_t.shape
        return slab.at[row:row + o, 0:i].set(w_t)

    w1t = params["w1"].T            # (16, d_in)
    w2t = params["w2"].T            # (8, 16)
    w3t = params["w3"].T            # (8, 24)
    w4t = params["w4"].T            # (16, 8)
    w5t = params["w5"].T            # (16, 24)
    w6t = params["w6"].T            # (d_out, 24)

    w_slab = put_w(w_slab, 0, w1t)
    w_slab = put_w(w_slab, 16, w2t)
    w_slab = put_w(w_slab, 24, w3t[:, 0:8])     # multiplies res2
    w_slab = put_w(w_slab, 32, w3t[:, 8:24])    # multiplies res1
    w_slab = put_w(w_slab, 40, w4t)
    w_slab = put_w(w_slab, 56, w5t[:, 0:16])    # multiplies res3
    w_slab = put_w(w_slab, 72, w5t[:, 16:24])   # multiplies latent
    w_slab = put_w(w_slab, 88, w6t[:, 0:16])    # multiplies res4
    w_slab = put_w(w_slab, 88 + pd_out, w6t[:, 16:24])  # multiplies latent

    b_slab = jnp.zeros((b_rows, 1), jnp.float32)

    def put_b(slab, row, b):  # b: (1, out)
        o = b.shape[1]
        return slab.at[row:row + o, 0].set(b[0])

    b_slab = put_b(b_slab, 0, params["b1"])
    b_slab = put_b(b_slab, 16, params["b2"])
    b_slab = put_b(b_slab, 24, params["b3"])
    b_slab = put_b(b_slab, 32, params["b4"])
    b_slab = put_b(b_slab, 48, params["b5"])
    b_slab = put_b(b_slab, 64, params["b6"])
    return w_slab, b_slab


# ---------------------------------------------------------------------------
# Tile selection: big tiles to amortize per-step overhead; prefer an even grid
# of length >= 2 so v7x's two TensorCores get a balanced split.
# ---------------------------------------------------------------------------
def _pick_tile_b(b_padded):
    cands = [c for c in (8192, 4096, 2048, 1024, 512, 256, 128)
             if b_padded % c == 0]
    for c in cands:                       # even grid >= 2 (v7x: both TCs, balanced)
        g = b_padded // c
        if g >= 2 and g % 2 == 0:
            return c
    for c in cands:                       # any grid >= 2
        if b_padded // c >= 2:
            return c
    return cands[0]                       # tiny batch -> single step


# ---------------------------------------------------------------------------
# Wrapper: grids the (padded) batch; parameter slabs stay VMEM-resident.
# No host-side transposes or reshapes of x / out / latent.
# ---------------------------------------------------------------------------
@functools.partial(jax.jit, static_argnames=("d_out",))
def simplest_autoencoder(x, w_slab, b_slab, *, d_out):
    """Pallas forward. x: (B, d_in). Returns (out (B, d_out), latent (B, 8))."""
    B, d_in = x.shape

    # Pad batch to a multiple of 128 so internal (features, tile_b) activations
    # stay lane-dense and the in-kernel transposes see tile-aligned shapes.
    B_pad = (B + 127) // 128 * 128
    x_p = x if B_pad == B else jnp.pad(x, ((0, B_pad - B), (0, 0)))

    tile_b = _pick_tile_b(B_pad)
    grid = (B_pad // tile_b,)

    kernel = functools.partial(autoencoder_kernel, d_in=d_in, d_out=d_out)

    macs_per_row = (16 * d_in + 8 * 16 + (8 * 8 + 8 * 16) + 16 * 8
                    + (16 * 16 + 16 * 8) + (d_out * 16 + d_out * 8))
    cost = pl.CostEstimate(
        flops=2 * B_pad * macs_per_row,
        transcendentals=0,
        bytes_accessed=4 * (B_pad * (d_in + d_out + 8)
                            + w_slab.size + b_slab.size),
    )

    out, lat = pl.pallas_call(
        kernel,
        grid=grid,
        in_specs=[
            pl.BlockSpec((tile_b, d_in), lambda i: (i, 0)),   # x tile (pipelined)
            pl.BlockSpec(w_slab.shape, lambda i: (0, 0)),     # weights: resident
            pl.BlockSpec(b_slab.shape, lambda i: (0, 0)),     # biases: resident
        ],
        out_specs=(
            pl.BlockSpec((tile_b, d_out), lambda i: (i, 0)),
            pl.BlockSpec((tile_b, 8), lambda i: (i, 0)),
        ),
        out_shape=(
            jax.ShapeDtypeStruct((B_pad, d_out), x.dtype),
            jax.ShapeDtypeStruct((B_pad, 8), x.dtype),
        ),
        compiler_params=pltpu.CompilerParams(
            dimension_semantics=("parallel",),    # v7x: shard batch over both TCs
            vmem_limit_bytes=32 * 1024 * 1024),   # headroom over v5e 16 MiB default
        cost_estimate=cost,
    )(x_p, w_slab, b_slab)

    if B_pad != B:
        out, lat = out[:B], lat[:B]
    return out, lat


# ---------------------------------------------------------------------------
# Init + pure-JAX reference (PyTorch forward semantics)
# ---------------------------------------------------------------------------
def init_params(key, input_window, output_window):
    """nn.Linear-style init (uniform +/- 1/sqrt(fan_in)); weights stored (in, out)."""
    d_in = input_window * 2
    d_out = output_window * 2
    dims = [
        ("w1", "b1", d_in, 16),
        ("w2", "b2", 16, 8),
        ("w3", "b3", 16 + 8, 8),
        ("w4", "b4", 8, 16),
        ("w5", "b5", 16 + 8, 16),
        ("w6", "b6", 8 + 16, d_out),
    ]
    params = {}
    for (wn, bn, fi, fo) in dims:
        key, kw, kb = jax.random.split(key, 3)
        bound = 1.0 / jnp.sqrt(fi)
        params[wn] = jax.random.uniform(kw, (fi, fo), jnp.float32,
                                        minval=-bound, maxval=bound)
        params[bn] = jax.random.uniform(kb, (1, fo), jnp.float32,
                                        minval=-bound, maxval=bound)
    return params


def reference_forward(x, p):
    res1 = _lrelu(x @ p["w1"] + p["b1"])
    res2 = _lrelu(res1 @ p["w2"] + p["b2"])
    latent = _lrelu(jnp.concatenate([res2, res1], axis=-1) @ p["w3"] + p["b3"])
    res3 = _lrelu(latent @ p["w4"] + p["b4"])
    res4 = _lrelu(jnp.concatenate([res3, latent], axis=-1) @ p["w5"] + p["b5"])
    out = jnp.concatenate([res4, latent], axis=-1) @ p["w6"] + p["b6"]
    return out, latent


if __name__ == "__main__":
    INPUT_WINDOW = 8     # -> input dim 16
    OUTPUT_WINDOW = 8    # -> output dim 16
    BATCH = 1024         # exercises the gridded path: TILE_B=512, grid=(2,) (even)

    key = jax.random.PRNGKey(0)
    key, kx = jax.random.split(key)
    x = jax.random.normal(kx, (BATCH, INPUT_WINDOW * 2), dtype=jnp.float32)
    params = init_params(key, INPUT_WINDOW, OUTPUT_WINDOW)

    d_in = INPUT_WINDOW * 2
    d_out = OUTPUT_WINDOW * 2
    w_slab, b_slab = pack_params(params, d_in, d_out)

    out, latent = simplest_autoencoder(x, w_slab, b_slab, d_out=d_out)
    out = jax.block_until_ready(out)
    latent = jax.block_until_ready(latent)

    ref_out, ref_latent = reference_forward(x, params)
    assert jnp.allclose(out, ref_out, atol=1e-5, rtol=1e-5), "output mismatch"
    assert jnp.allclose(latent, ref_latent, atol=1e-5, rtol=1e-5), "latent mismatch"

    print("KERNEL_OK")
</pallas_src>

<mosaic_0001>
module attributes {stable_mosaic.version = 11 : i64} {
  func.func @autoencoder_kernel(%arg0: i32, %arg1: memref<512x16xf32, #tpu.memory_space<vmem>>, %arg2: memref<120x128xf32, #tpu.memory_space<vmem>>, %arg3: memref<80x1xf32, #tpu.memory_space<vmem>>, %arg4: memref<512x16xf32, #tpu.memory_space<vmem>>, %arg5: memref<512x8xf32, #tpu.memory_space<vmem>>) attributes {dimension_semantics = [#tpu.dimension_semantics<parallel>], iteration_bounds = array<i64: 2>, scalar_prefetch = 0 : i64, scratch_operands = 0 : i64, tpu.core_type = #tpu.core_type<tc>, window_params = [{transform_indices = @transform_0, window_bounds = array<i64: 512, 16>}, {pipeline_mode = #tpu.pipeline_mode<synchronous>, transform_indices = @transform_1, window_bounds = array<i64: 120, 128>}, {pipeline_mode = #tpu.pipeline_mode<synchronous>, transform_indices = @transform_2, window_bounds = array<i64: 80, 1>}, {transform_indices = @transform_3, window_bounds = array<i64: 512, 16>}, {transform_indices = @transform_4, window_bounds = array<i64: 512, 8>}]} {
    %c0 = arith.constant 0 : index
    %c0_0 = arith.constant 0 : index
    %0 = vector.load %arg1[%c0, %c0_0] : memref<512x16xf32, #tpu.memory_space<vmem>>, vector<512x16xf32>
    %c0_1 = arith.constant 0 : index
    %c0_2 = arith.constant 0 : index
    %1 = vector.load %arg2[%c0_1, %c0_2] : memref<120x128xf32, #tpu.memory_space<vmem>>, vector<16x16xf32>
    %cst = arith.constant dense<0.000000e+00> : vector<16x512xf32>
    %2 = tpu.matmul %1, %0, %cst {dimension_numbers = #tpu.dot_dimension_numbers<[1], [1], [0], [0], [0, 0, 1, 0], [], []>} : vector<16x16xf32>, vector<512x16xf32>, vector<16x512xf32> -> vector<16x512xf32>
    %c0_3 = arith.constant 0 : index
    %c0_4 = arith.constant 0 : index
    %3 = vector.load %arg3[%c0_3, %c0_4] : memref<80x1xf32, #tpu.memory_space<vmem>>, vector<16x1xf32>
    %4 = vector.broadcast %3 : vector<16x1xf32> to vector<16x512xf32>
    %5 = arith.addf %2, %4 : vector<16x512xf32>
    %cst_5 = arith.constant 0.00999999977 : f32
    %6 = vector.broadcast %cst_5 : f32 to vector<16x512xf32>
    %7 = arith.mulf %6, %5 : vector<16x512xf32>
    %8 = arith.maximumf %5, %7 : vector<16x512xf32>
    %c16 = arith.constant 16 : index
    %c0_6 = arith.constant 0 : index
    %9 = vector.load %arg2[%c16, %c0_6] : memref<120x128xf32, #tpu.memory_space<vmem>>, vector<8x16xf32>
    %cst_7 = arith.constant dense<0.000000e+00> : vector<8x512xf32>
    %10 = tpu.matmul %9, %8, %cst_7 {dimension_numbers = #tpu.dot_dimension_numbers<[1], [0], [0], [1], [0, 0, 1, 1], [], []>} : vector<8x16xf32>, vector<16x512xf32>, vector<8x512xf32> -> vector<8x512xf32>
    %c16_8 = arith.constant 16 : index
    %c0_9 = arith.constant 0 : index
    %11 = vector.load %arg3[%c16_8, %c0_9] : memref<80x1xf32, #tpu.memory_space<vmem>>, vector<8x1xf32>
    %12 = vector.broadcast %11 : vector<8x1xf32> to vector<8x512xf32>
    %13 = arith.addf %10, %12 : vector<8x512xf32>
    %cst_10 = arith.constant 0.00999999977 : f32
    %14 = vector.broadcast %cst_10 : f32 to vector<8x512xf32>
    %15 = arith.mulf %14, %13 : vector<8x512xf32>
    %16 = arith.maximumf %13, %15 : vector<8x512xf32>
    %c24 = arith.constant 24 : index
    %c0_11 = arith.constant 0 : index
    %17 = vector.load %arg2[%c24, %c0_11] : memref<120x128xf32, #tpu.memory_space<vmem>>, vector<8x8xf32>
    %cst_12 = arith.constant dense<0.000000e+00> : vector<8x512xf32>
    %18 = tpu.matmul %17, %16, %cst_12 {dimension_numbers = #tpu.dot_dimension_numbers<[1], [0], [0], [1], [0, 0, 1, 1], [], []>} : vector<8x8xf32>, vector<8x512xf32>, vector<8x512xf32> -> vector<8x512xf32>
    %c32 = arith.constant 32 : index
    %c0_13 = arith.constant 0 : index
    %19 = vector.load %arg2[%c32, %c0_13] : memref<120x128xf32, #tpu.memory_space<vmem>>, vector<8x16xf32>
    %cst_14 = arith.constant dense<0.000000e+00> : vector<8x512xf32>
    %20 = tpu.matmul %19, %8, %cst_14 {dimension_numbers = #tpu.dot_dimension_numbers<[1], [0], [0], [1], [0, 0, 1, 1], [], []>} : vector<8x16xf32>, vector<16x512xf32>, vector<8x512xf32> -> vector<8x512xf32>
    %21 = arith.addf %18, %20 : vector<8x512xf32>
    %c24_15 = arith.constant 24 : index
    %c0_16 = arith.constant 0 : index
    %22 = vector.load %arg3[%c24_15, %c0_16] : memref<80x1xf32, #tpu.memory_space<vmem>>, vector<8x1xf32>
    %23 = vector.broadcast %22 : vector<8x1xf32> to vector<8x512xf32>
    %24 = arith.addf %21, %23 : vector<8x512xf32>
    %cst_17 = arith.constant 0.00999999977 : f32
    %25 = vector.broadcast %cst_17 : f32 to vector<8x512xf32>
    %26 = arith.mulf %25, %24 : vector<8x512xf32>
    %27 = arith.maximumf %24, %26 : vector<8x512xf32>
    %c40 = arith.constant 40 : index
    %c0_18 = arith.constant 0 : index
    %28 = vector.load %arg2[%c40, %c0_18] : memref<120x128xf32, #tpu.memory_space<vmem>>, vector<16x8xf32>
    %cst_19 = arith.constant dense<0.000000e+00> : vector<16x512xf32>
    %29 = tpu.matmul %28, %27, %cst_19 {dimension_numbers = #tpu.dot_dimension_numbers<[1], [0], [0], [1], [0, 0, 1, 1], [], []>} : vector<16x8xf32>, vector<8x512xf32>, vector<16x512xf32> -> vector<16x512xf32>
    %c32_20 = arith.constant 32 : index
    %c0_21 = arith.constant 0 : index
    %30 = vector.load %arg3[%c32_20, %c0_21] : memref<80x1xf32, #tpu.memory_space<vmem>>, vector<16x1xf32>
    %31 = vector.broadcast %30 : vector<16x1xf32> to vector<16x512xf32>
    %32 = arith.addf %29, %31 : vector<16x512xf32>
    %cst_22 = arith.constant 0.00999999977 : f32
    %33 = vector.broadcast %cst_22 : f32 to vector<16x512xf32>
    %34 = arith.mulf %33, %32 : vector<16x512xf32>
    %35 = arith.maximumf %32, %34 : vector<16x512xf32>
    %c56 = arith.constant 56 : index
    %c0_23 = arith.constant 0 : index
    %36 = vector.load %arg2[%c56, %c0_23] : memref<120x128xf32, #tpu.memory_space<vmem>>, vector<16x16xf32>
    %cst_24 = arith.constant dense<0.000000e+00> : vector<16x512xf32>
    %37 = tpu.matmul %36, %35, %cst_24 {dimension_numbers = #tpu.dot_dimension_numbers<[1], [0], [0], [1], [0, 0, 1, 1], [], []>} : vector<16x16xf32>, vector<16x512xf32>, vector<16x512xf32> -> vector<16x512xf32>
    %c72 = arith.constant 72 : index
    %c0_25 = arith.constant 0 : index
    %38 = vector.load %arg2[%c72, %c0_25] : memref<120x128xf32, #tpu.memory_space<vmem>>, vector<16x8xf32>
    %cst_26 = arith.constant dense<0.000000e+00> : vector<16x512xf32>
    %39 = tpu.matmul %38, %27, %cst_26 {dimension_numbers = #tpu.dot_dimension_numbers<[1], [0], [0], [1], [0, 0, 1, 1], [], []>} : vector<16x8xf32>, vector<8x512xf32>, vector<16x512xf32> -> vector<16x512xf32>
    %40 = arith.addf %37, %39 : vector<16x512xf32>
    %c48 = arith.constant 48 : index
    %c0_27 = arith.constant 0 : index
    %41 = vector.load %arg3[%c48, %c0_27] : memref<80x1xf32, #tpu.memory_space<vmem>>, vector<16x1xf32>
    %42 = vector.broadcast %41 : vector<16x1xf32> to vector<16x512xf32>
    %43 = arith.addf %40, %42 : vector<16x512xf32>
    %cst_28 = arith.constant 0.00999999977 : f32
    %44 = vector.broadcast %cst_28 : f32 to vector<16x512xf32>
    %45 = arith.mulf %44, %43 : vector<16x512xf32>
    %46 = arith.maximumf %43, %45 : vector<16x512xf32>
    %c88 = arith.constant 88 : index
    %c0_29 = arith.constant 0 : index
    %47 = vector.load %arg2[%c88, %c0_29] : memref<120x128xf32, #tpu.memory_space<vmem>>, vector<16x16xf32>
    %cst_30 = arith.constant dense<0.000000e+00> : vector<16x512xf32>
    %48 = tpu.matmul %47, %46, %cst_30 {dimension_numbers = #tpu.dot_dimension_numbers<[1], [0], [0], [1], [0, 0, 1, 1], [], []>} : vector<16x16xf32>, vector<16x512xf32>, vector<16x512xf32> -> vector<16x512xf32>
    %c104 = arith.constant 104 : index
    %c0_31 = arith.constant 0 : index
    %49 = vector.load %arg2[%c104, %c0_31] : memref<120x128xf32, #tpu.memory_space<vmem>>, vector<16x8xf32>
    %cst_32 = arith.constant dense<0.000000e+00> : vector<16x512xf32>
    %50 = tpu.matmul %49, %27, %cst_32 {dimension_numbers = #tpu.dot_dimension_numbers<[1], [0], [0], [1], [0, 0, 1, 1], [], []>} : vector<16x8xf32>, vector<8x512xf32>, vector<16x512xf32> -> vector<16x512xf32>
    %51 = arith.addf %48, %50 : vector<16x512xf32>
    %c64 = arith.constant 64 : index
    %c0_33 = arith.constant 0 : index
    %52 = vector.load %arg3[%c64, %c0_33] : memref<80x1xf32, #tpu.memory_space<vmem>>, vector<16x1xf32>
    %53 = vector.broadcast %52 : vector<16x1xf32> to vector<16x512xf32>
    %54 = arith.addf %51, %53 : vector<16x512xf32>
    %55 = tpu.transpose %54, [1, 0] : vector<16x512xf32> -> vector<512x16xf32>
    %c0_34 = arith.constant 0 : index
    %c0_35 = arith.constant 0 : index
    %56 = vector.load %arg4[%c0_34, %c0_35] : memref<512x16xf32, #tpu.memory_space<vmem>>, vector<512x16xf32>
    tpu.vector_store %arg4[%c0_34, %c0_35], %55 {strides = array<i32>} : memref<512x16xf32, #tpu.memory_space<vmem>>, vector<512x16xf32>,
    %57 = tpu.transpose %27, [1, 0] : vector<8x512xf32> -> vector<512x8xf32>
    %c0_36 = arith.constant 0 : index
    %c0_37 = arith.constant 0 : index
    %58 = vector.load %arg5[%c0_36, %c0_37] : memref<512x8xf32, #tpu.memory_space<vmem>>, vector<512x8xf32>
    tpu.vector_store %arg5[%c0_36, %c0_37], %57 {strides = array<i32>} : memref<512x8xf32, #tpu.memory_space<vmem>>, vector<512x8xf32>,
    return
  }
  func.func @transform_0(%arg0: i32) -> (i32, i32) {
    %c0_i32 = arith.constant 0 : i32
    %c0_i32_0 = arith.constant 0 : i32
    return %arg0, %c0_i32 : i32, i32
  }
  func.func @transform_1(%arg0: i32) -> (i32, i32) {
    %c0_i32 = arith.constant 0 : i32
    %c0_i32_0 = arith.constant 0 : i32
    %c0_i32_1 = arith.constant 0 : i32
    return %c0_i32, %c0_i32_0 : i32, i32
  }
  func.func @transform_2(%arg0: i32) -> (i32, i32) {
    %c0_i32 = arith.constant 0 : i32
    %c0_i32_0 = arith.constant 0 : i32
    %c0_i32_1 = arith.constant 0 : i32
    return %c0_i32, %c0_i32_0 : i32, i32
  }
  func.func @transform_3(%arg0: i32) -> (i32, i32) {
    %c0_i32 = arith.constant 0 : i32
    %c0_i32_0 = arith.constant 0 : i32
    return %arg0, %c0_i32 : i32, i32
  }
  func.func @transform_4(%arg0: i32) -> (i32, i32) {
    %c0_i32 = arith.constant 0 : i32
    %c0_i32_0 = arith.constant 0 : i32
    return %arg0, %c0_i32 : i32, i32
  }
}

</mosaic_0001>

<bundles_post_ra>
// kernel: simplest_autoencoder.1
= control target key start
LH: loop header
LB: loop body
LE: loop exit
PB: predicated region body
PF: predicated region fallthrough
CT: control target
= control target key end

     0   :  { %s2875_s15 = smov 0   ;;  %s3473_s0 = inlined_call_operand.vmem [shape: f32[1024,16], index: 0, kind: input, shape index: {}]   ;;  %s3474_s1 = inlined_call_operand.vmem [shape: f32[120,128], index: 1, kind: input, shape index: {}]   ;;  %s3475_s2 = inlined_call_operand.vmem [shape: f32[80,1], index: 2, kind: input, shape index: {}]   ;;  %s3476_s3 = inlined_call_operand.vmem [shape: f32[1024,16], index: 3, kind: output, shape index: {0}]   ;;  %s3477_s4 = inlined_call_operand.vmem [shape: f32[1024,8], index: 4, kind: output, shape index: {1}]  }
   0x1 LB: > { %s2501_s16 = sadd.s32 4294967295, %s2846_s15   ;;  %p2505_p0 = scmp.ge.s32.totalorder %s2846_s15, 1  ;;  %s2846_s15 = sphi %s2875_s15, %s15_s15  }
   0x2   : > { %p166_p1 = scmp.lt.s32.totalorder %s2846_s15, 3 }
   0x4   : > { %p167_p2 = pnand %p2505_p0, %p166_p1 }
   0x5   : > { %s2506_s17 = sshll.u32 (!%p167_p2), %s2501_s16, 6  ;;  %vm293_vm0 = vcmask (!%p167_p2), 130048   ;;  %v2886_v0 = vld [vmem:[%s3474_s1] sm:$0xff] (!%p167_p2)  ;;  %v2848_v2 = vmov (!%p167_p2), 0   ;;  %v282_v3 = vld [vmem:[%s3475_s2 + $0x8] sm:$0xff] (!%p167_p2)  ;;  %v1647_v24 = vld [vmem:[%s3475_s2 + $0x30] sm:$0xff] (!%p167_p2) }
   0x6   : > { %170 = sbr.rel (%p167_p2) target bundleno = 1746 (0x6d2), region = 32  ;;  %v281_v1 = vld [vmem:[%s3475_s2] sm:$0xff] (!%p167_p2)  ;;  %p198_p3 = scmp.lt.s32.totalorder (!%p167_p2), %s2506_s17, 127  ;;  %2640 = vmatprep.mubr.msk.f32.mxu0 (!%p167_p2), %vm293_vm0, %v2886_v0  ;;  %2676 = vmatprep.mubr.msk.f32.mxu1 (!%p167_p2), %vm293_vm0, %v2886_v0  ;;  %vm2908_vm1 = vmpackc.low (!%p167_p2), %vm293_vm0, %vm293_vm0  ;;  %v2849_v4 = vmov (!%p167_p2), 0.0   ;;  %vm969_vm2 = vcmask (!%p167_p2), 64512  }
   0x7   : > { %2838 = vset.pattern.permute.xlu0 (!%p167_p2), %v2848_v2  ;;  %2839 = vset.pattern.permute.xlu1 (!%p167_p2), %v2848_v2  ;;  %v1135_v8 = vld [vmem:[%s3475_s2 + $0x20] sm:$0xff] (!%p167_p2) }
   0x8   : > { %285 = vperm.xlu0 (!%p167_p2), %2838, %v281_v1   ;;  %v2007_v37 = vld [vmem:[%s3475_s2 + $0x40] sm:$0xff] (!%p167_p2) }
   0xc   : > { %290 = vperm.xlu0 (!%p167_p2), %2838, %v282_v3  }
   0xd   : > { %s3481_s17 = smov (!%p198_p3, %s2506_s17), 127 }
   0xe   : > { %s2898_s24 = sshll.u32 %s3481_s17, 3 }
   0xf   : > { %s2904_s27 = scalar_lea.vmem %s3473_s0, %s2898_s24  ;;  %s3196_s26 = scalar_lea.vmem %s3477_s4, %s2898_s24 }
  0x10   : > { %v231_v5 = vld [vmem:[%s2904_s27 + $0x80] sm:$0xff]  ;;  %v232_v6 = vld [vmem:[%s2904_s27 + $0x88] sm:$0xff]  ;;  %v233_v17 = vld [vmem:[%s2904_s27 + $0x90] sm:$0xff]  ;;  %1139 = vperm.xlu0 %2838, %v1135_v8   ;;  %s3276_s29 = scalar_lea.vmem %s3476_s3, %s2898_s24 }
  0x11   : > { %v263_v7 = vld [vmem:[%s2904_s27 + $0x180] sm:$0xff]  ;;  %v2680_v9 = vpack.c.bf16 %v232_v6, %v231_v5  ;;  %v264_v10 = vld [vmem:[%s2904_s27 + $0x188] sm:$0xff]  ;;  %v234_v19 = vld [vmem:[%s2904_s27 + $0x98] sm:$0xff] }
  0x12   : > { %v215_v11 = vld [vmem:[%s2904_s27] sm:$0xff]  ;;  %v216_v12 = vld [vmem:[%s2904_s27 + $0x8] sm:$0xff]  ;;  %v2728_v13 = vpack.c.bf16 %v264_v10, %v263_v7  ;;  %v265_v20 = vld [vmem:[%s2904_s27 + $0x190] sm:$0xff]  ;;  %v2686_v22 = vpack.c.bf16 %v234_v19, %v233_v17 }
  0x13   : > { %v2683_v14 = vpack.c.bf16 %v216_v12, %v215_v11  ;;  %v247_v15 = vld [vmem:[%s2904_s27 + $0x100] sm:$0xff]  ;;  %v248_v16 = vld [vmem:[%s2904_s27 + $0x108] sm:$0xff]  ;;  %2682 = vmatprep.subr.msk.bf16.mxu0 %vm2908_vm1, %v2680_v9  ;;  %v266_v21 = vld [vmem:[%s2904_s27 + $0x198] sm:$0xff] }
  0x14   : > { %v2731_v18 = vpack.c.bf16 %v248_v16, %v247_v15  ;;  %2730 = vmatprep.subr.msk.bf16.mxu1 %vm2908_vm1, %v2728_v13  ;;  %v2734_v23 = vpack.c.bf16 %v266_v21, %v265_v20  ;;  %v217_v25 = vld [vmem:[%s2904_s27 + $0x10] sm:$0xff]  ;;  %v218_v26 = vld [vmem:[%s2904_s27 + $0x18] sm:$0xff]  ;;  %v235_v29 = vld [vmem:[%s2904_s27 + $0xa0] sm:$0xff]  ;;  %1651 = vperm.xlu0 %2838, %v1647_v24  }
  0x15   : > { %2685 = vmatpush3.bf16.xpose.msk.msra.mxu0 %vm2908_vm1, %v2683_v14  ;;  %v249_v27 = vld [vmem:[%s2904_s27 + $0x110] sm:$0xff]  ;;  %v250_v28 = vld [vmem:[%s2904_s27 + $0x118] sm:$0xff]  ;;  %v236_v30 = vld [vmem:[%s2904_s27 + $0xa8] sm:$0xff]  ;;  %v2689_v33 = vpack.c.bf16 %v218_v26, %v217_v25 }
  0x16   : > { %2733 = vmatpush3.bf16.xpose.msk.msra.mxu1 %vm2908_vm1, %v2731_v18  ;;  %2688 = vmatprep.subr.msk.bf16.mxu0 %vm2908_vm1, %v2686_v22  ;;  %v267_v31 = vld [vmem:[%s2904_s27 + $0x1a0] sm:$0xff]  ;;  %v268_v32 = vld [vmem:[%s2904_s27 + $0x1a8] sm:$0xff]  ;;  %v2737_v34 = vpack.c.bf16 %v250_v28, %v249_v27  ;;  %v2692_v35 = vpack.c.bf16 %v236_v30, %v235_v29  ;;  %v237_v42 = vld [vmem:[%s2904_s27 + $0xb0] sm:$0xff] }
  0x17   : > { %2736 = vmatprep.subr.msk.bf16.mxu1 %vm2908_vm1, %v2734_v23  ;;  %v2740_v36 = vpack.c.bf16 %v268_v32, %v267_v31  ;;  %v219_v38 = vld [vmem:[%s2904_s27 + $0x20] sm:$0xff]  ;;  %v220_v39 = vld [vmem:[%s2904_s27 + $0x28] sm:$0xff]  ;;  %v238_v43 = vld [vmem:[%s2904_s27 + $0xb8] sm:$0xff] }
  0x18   : > { %v251_v40 = vld [vmem:[%s2904_s27 + $0x120] sm:$0xff]  ;;  %v252_v41 = vld [vmem:[%s2904_s27 + $0x128] sm:$0xff]  ;;  %2011 = vperm.xlu0 %2838, %v2007_v37   ;;  %v269_v44 = vld [vmem:[%s2904_s27 + $0x1b0] sm:$0xff]  ;;  %v2695_v46 = vpack.c.bf16 %v220_v39, %v219_v38  ;;  %v2698_v48 = vpack.c.bf16 %v238_v43, %v237_v42 }
  0x19   : > { %v270_v45 = vld [vmem:[%s2904_s27 + $0x1b8] sm:$0xff]  ;;  %v2743_v47 = vpack.c.bf16 %v252_v41, %v251_v40  ;;  %v221_v50 = vld [vmem:[%s2904_s27 + $0x30] sm:$0xff]  ;;  %v239_v54 = vld [vmem:[%s2904_s27 + $0xc0] sm:$0xff] }
  0x1a   : > { %v2746_v49 = vpack.c.bf16 %v270_v45, %v269_v44  ;;  %v222_v51 = vld [vmem:[%s2904_s27 + $0x38] sm:$0xff]  ;;  %v253_v52 = vld [vmem:[%s2904_s27 + $0x130] sm:$0xff]  ;;  %v240_v55 = vld [vmem:[%s2904_s27 + $0xc8] sm:$0xff] }
  0x1b   : > { %v254_v53 = vld [vmem:[%s2904_s27 + $0x138] sm:$0xff]  ;;  %v271_v56 = vld [vmem:[%s2904_s27 + $0x1c0] sm:$0xff]  ;;  %v272_v57 = vld [vmem:[%s2904_s27 + $0x1c8] sm:$0xff]  ;;  %v2701_v58 = vpack.c.bf16 %v222_v51, %v221_v50  ;;  %v2704_v60 = vpack.c.bf16 %v240_v55, %v239_v54 }
  0x1c   : > { %v2749_v59 = vpack.c.bf16 %v254_v53, %v253_v52  ;;  %v2752_v61 = vpack.c.bf16 %v272_v57, %v271_v56  ;;  %v223_v62 = vld [vmem:[%s2904_s27 + $0x40] sm:$0xff]  ;;  %v224_v63 = vld [vmem:[%s2904_s27 + $0x48] sm:$0xff]  ;;  %v241_v3 = vld [vmem:[%s2904_s27 + $0xd0] sm:$0xff] }
  0x1d   : > { %2691 = vmatpush3.bf16.xpose.msk.msra.mxu0 %vm2908_vm1, %v2689_v33  ;;  %v255_v1 = vld [vmem:[%s2904_s27 + $0x140] sm:$0xff]  ;;  %v256_v2 = vld [vmem:[%s2904_s27 + $0x148] sm:$0xff]  ;;  %v242_v5 = vld [vmem:[%s2904_s27 + $0xd8] sm:$0xff]  ;;  %v2707_v8 = vpack.c.bf16 %v224_v63, %v223_v62 }
  0x1e   : > { %2739 = vmatpush3.bf16.xpose.msk.msra.mxu1 %vm2908_vm1, %v2737_v34  ;;  %2694 = vmatprep.subr.msk.bf16.mxu0 %vm2908_vm1, %v2692_v35  ;;  %v273_v6 = vld [vmem:[%s2904_s27 + $0x1d0] sm:$0xff]  ;;  %v274_v7 = vld [vmem:[%s2904_s27 + $0x1d8] sm:$0xff]  ;;  %v2755_v9 = vpack.c.bf16 %v256_v2, %v255_v1  ;;  %v2710_v10 = vpack.c.bf16 %v242_v5, %v241_v3  ;;  %v243_v16 = vld [vmem:[%s2904_s27 + $0xe0] sm:$0xff] }
  0x1f   : > { %2742 = vmatprep.subr.msk.bf16.mxu1 %vm2908_vm1, %v2740_v36  ;;  %v2758_v11 = vpack.c.bf16 %v274_v7, %v273_v6  ;;  %v225_v12 = vld [vmem:[%s2904_s27 + $0x50] sm:$0xff]  ;;  %v226_v13 = vld [vmem:[%s2904_s27 + $0x58] sm:$0xff]  ;;  %v244_v17 = vld [vmem:[%s2904_s27 + $0xe8] sm:$0xff] }
  0x20   : > { %v257_v14 = vld [vmem:[%s2904_s27 + $0x150] sm:$0xff]  ;;  %v258_v15 = vld [vmem:[%s2904_s27 + $0x158] sm:$0xff]  ;;  %v275_v18 = vld [vmem:[%s2904_s27 + $0x1e0] sm:$0xff]  ;;  %v2713_v20 = vpack.c.bf16 %v226_v13, %v225_v12  ;;  %v2716_v22 = vpack.c.bf16 %v244_v17, %v243_v16 }
  0x21   : > { %v276_v19 = vld [vmem:[%s2904_s27 + $0x1e8] sm:$0xff]  ;;  %v2761_v21 = vpack.c.bf16 %v258_v15, %v257_v14  ;;  %v227_v24 = vld [vmem:[%s2904_s27 + $0x60] sm:$0xff]  ;;  %v245_v28 = vld [vmem:[%s2904_s27 + $0xf0] sm:$0xff] }
  0x22   : > { %v2764_v23 = vpack.c.bf16 %v276_v19, %v275_v18  ;;  %v228_v25 = vld [vmem:[%s2904_s27 + $0x68] sm:$0xff]  ;;  %v259_v26 = vld [vmem:[%s2904_s27 + $0x160] sm:$0xff]  ;;  %v246_v29 = vld [vmem:[%s2904_s27 + $0xf8] sm:$0xff] }
  0x23   : > { %v260_v27 = vld [vmem:[%s2904_s27 + $0x168] sm:$0xff]  ;;  %v277_v30 = vld [vmem:[%s2904_s27 + $0x1f0] sm:$0xff]  ;;  %v278_v31 = vld [vmem:[%s2904_s27 + $0x1f8] sm:$0xff]  ;;  %v2719_v32 = vpack.c.bf16 %v228_v25, %v227_v24  ;;  %v2722_v34 = vpack.c.bf16 %v246_v29, %v245_v28 }
  0x24   : > { %v2767_v33 = vpack.c.bf16 %v260_v27, %v259_v26  ;;  %v2770_v35 = vpack.c.bf16 %v278_v31, %v277_v30  ;;  %v229_v36 = vld [vmem:[%s2904_s27 + $0x70] sm:$0xff]  ;;  %v230_v37 = vld [vmem:[%s2904_s27 + $0x78] sm:$0xff]  ;;  %v280_v42 = vld [vmem:[%s3474_s1 + $0x8] sm:$0xff] }
  0x25   : > { %2697 = vmatpush3.bf16.xpose.msk.msra.mxu0 %vm2908_vm1, %v2695_v46  ;;  %v261_v38 = vld [vmem:[%s2904_s27 + $0x170] sm:$0xff]  ;;  %v262_v39 = vld [vmem:[%s2904_s27 + $0x178] sm:$0xff]  ;;  %v2725_v40 = vpack.c.bf16 %v230_v37, %v229_v36  ;;  %v1136_v44 = vld [vmem:[%s3475_s2 + $0x28] sm:$0xff] }
  0x26   : > { %2745 = vmatpush3.bf16.xpose.msk.msra.mxu1 %vm2908_vm1, %v2743_v47  ;;  %2700 = vmatprep.subr.msk.bf16.mxu0 %vm2908_vm1, %v2698_v48  ;;  %v2773_v41 = vpack.c.bf16 %v262_v39, %v261_v38  ;;  %v663_v43 = vld [vmem:[%s3475_s2 + $0x10] sm:$0xff]  ;;  %v1648_v45 = vld [vmem:[%s3475_s2 + $0x38] sm:$0xff]  ;;  %v2008_v46 = vld [vmem:[%s3475_s2 + $0x48] sm:$0xff] }
  0x27   : > { %2748 = vmatprep.subr.msk.bf16.mxu1 %vm2908_vm1, %v2746_v49  ;;  %666 = vperm.xlu1 %2839, %v663_v43   ;;  %v823_v24 = vld [vmem:[%s3474_s1 + $0x20] sm:$0xff] }
  0x2d   : > { %2703 = vmatpush3.bf16.xpose.msk.msra.mxu0 %vm2908_vm1, %v2701_v58 }
  0x2e   : > { %2751 = vmatpush3.bf16.xpose.msk.msra.mxu1 %vm2908_vm1, %v2749_v59  ;;  %2706 = vmatprep.subr.msk.bf16.mxu0 %vm2908_vm1, %v2704_v60 }
  0x2f   : > { %2754 = vmatprep.subr.msk.bf16.mxu1 %vm2908_vm1, %v2752_v61 }
  0x35   : > { %2709 = vmatpush3.bf16.xpose.msk.msra.mxu0 %vm2908_vm1, %v2707_v8 }
  0x36   : > { %2757 = vmatpush3.bf16.xpose.msk.msra.mxu1 %vm2908_vm1, %v2755_v9  ;;  %2712 = vmatprep.subr.msk.bf16.mxu0 %vm2908_vm1, %v2710_v10 }
  0x37   : > { %2760 = vmatprep.subr.msk.bf16.mxu1 %vm2908_vm1, %v2758_v11 }
  0x3d   : > { %2715 = vmatpush3.bf16.xpose.msk.msra.mxu0 %vm2908_vm1, %v2713_v20 }
  0x3e   : > { %2763 = vmatpush3.bf16.xpose.msk.msra.mxu1 %vm2908_vm1, %v2761_v21  ;;  %2718 = vmatprep.subr.msk.bf16.mxu0 %vm2908_vm1, %v2716_v22 }
  0x3f   : > { %2766 = vmatprep.subr.msk.bf16.mxu1 %vm2908_vm1, %v2764_v23  ;;  %v662_v23 = vld [vmem:[%s3474_s1 + $0x10] sm:$0xff] }
  0x45   : > { %2721 = vmatpush3.bf16.xpose.msk.msra.mxu0 %vm2908_vm1, %v2719_v32 }
  0x46   : > { %2769 = vmatpush3.bf16.xpose.msk.msra.mxu1 %vm2908_vm1, %v2767_v33  ;;  %2724 = vmatprep.subr.msk.bf16.mxu0 %vm2908_vm1, %v2722_v34 }
  0x47   : > { %2772 = vmatprep.subr.msk.bf16.mxu1 %vm2908_vm1, %v2770_v35 }
  0x4d   : > { %2727 = vmatpush3.bf16.xpose.msk.msra.mxu0 %vm2908_vm1, %v2725_v40 }
  0x4e   : > { %2775 = vmatpush3.bf16.xpose.msk.msra.mxu1 %vm2908_vm1, %v2773_v41  ;;  %v822_v41 = vld [vmem:[%s3474_s1 + $0x18] sm:$0xff] }
  0x54   : > { %2641 = vmatmul.mubr.msk.f32.vlgmr.msra.gmra.mrb[0].mxu0 %vm293_vm0, %v2886_v0 }
  0x55   : > { %2677 = vmatmul.mubr.msk.f32.vlgmr.msra.gmra.mrb[0].mxu1 %vm293_vm0, %v2886_v0  ;;  %2642 = vmatprep.mubr.msk.f32.mxu0 %vm293_vm0, %v280_v42  ;;  %v1115_v0 = vld [vmem:[%s3475_s2 + $0x18] sm:$0xff] }
  0x56   : > { %2678 = vmatprep.mubr.msk.f32.mxu1 %vm293_vm0, %v280_v42  ;;  %1118 = vperm.xlu1 %2839, %v1115_v0  }
  0x58   : > { %2643 = vmatmul.mubr.msk.f32.gmra.mrb[2].mxu0 %vm293_vm0, %v280_v42 }
  0x59   : > { %2679 = vmatmul.mubr.msk.f32.gmra.mrb[2].mxu1 %vm293_vm0, %v280_v42  ;;  %736 = vmatprep.mubr.f32.mxu0 %v2849_v4 }
  0x5a   : > { %807 = vmatprep.mubr.f32.mxu1 %v2849_v4  ;;  %1144 = vperm.xlu1 %2839, %v1136_v44  }
  0x5e   : > { %1656 = vperm.xlu1 %2839, %v1648_v45  }
  0x62   : > { %2016 = vperm.xlu1 %2839, %v2008_v46  }
  0x87   : > { %v286_v47 = vpop.permute.xlu0 %285 }
  0x8b   : > { %v291_v56 = vpop.permute.xlu0 %290 }
  0xa6   : > { %v667_v25 = vpop.permute.xlu1 %666 }
  0xd5   : > { %v1119_v43 = vpop.permute.xlu1 %1118 }
 0x127   : > { %v558_v48 = vpop.f32.mrb[0].mxu0 }
 0x128   : > { %v559_v49 = vadd.f32 %v558_v48, %v286_v47  ;;  %v635_v50 = vpop.f32.mrb[0].mxu1  ;;  %v560_v51 = vpop.f32.mrb[1].mxu0 }
 0x129   : > { %v636_v52 = vadd.f32 %v635_v50, %v286_v47  ;;  %v561_v53 = vadd.f32 %v560_v51, %v286_v47  ;;  %v637_v54 = vpop.f32.mrb[1].mxu1 }
 0x12a   : > { %v638_v55 = vadd.f32 %v637_v54, %v286_v47  ;;  %v646_v58 = vmul.f32 0.01, %v559_v49 }
 0x12b   : > { %v564_v57 = vpop.f32.mrb[2].mxu0  ;;  %v648_v62 = vmul.f32 0.01, %v636_v52  ;;  %v647_v63 = vmul.f32 0.01, %v561_v53 }
 0x12c   : > { %v565_v59 = vadd.f32 %v564_v57, %v291_v56  ;;  %v641_v60 = vpop.f32.mrb[2].mxu1  ;;  %v566_v61 = vpop.f32.mrb[3].mxu0  ;;  %v649_v5 = vmul.f32 0.01, %v638_v55  ;;  %v654_v10 = vmax.f32 %v559_v49, %v646_v58  ;;  %v1133_v58 = vld [vmem:[%s3474_s1 + $0x28] sm:$0xff] }
 0x12d   : > { %v642_v1 = vadd.f32 %v641_v60, %v291_v56  ;;  %v567_v2 = vadd.f32 %v566_v61, %v291_v56  ;;  %v643_v3 = vpop.f32.mrb[3].mxu1  ;;  %v656_v13 = vmax.f32 %v636_v52, %v648_v62  ;;  %v655_v14 = vmax.f32 %v561_v53, %v647_v63  ;;  %v1134_v60 = vld [vmem:[%s3474_s1 + $0x30] sm:$0xff]  ;;  %v1325_v61 = vld [vmem:[%s3474_s1 + $0x48] sm:$0xff]  ;;  %v1140_v63 = vpop.permute.xlu0 %1139 }
 0x12e   : > { %v650_v6 = vmul.f32 0.01, %v565_v59  ;;  %v644_v7 = vadd.f32 %v643_v3, %v291_v56  ;;  %v657_v17 = vmax.f32 %v638_v55, %v649_v5  ;;  %v1326_v62 = vld [vmem:[%s3474_s1 + $0x50] sm:$0xff] }
 0x12f   : > { %v652_v8 = vmul.f32 0.01, %v642_v1  ;;  %v651_v9 = vmul.f32 0.01, %v567_v2 }
 0x130   : > { %v658_v11 = vmax.f32 %v565_v59, %v650_v6  ;;  %v653_v12 = vmul.f32 0.01, %v644_v7 }
 0x131   : > { %v660_v15 = vmax.f32 %v642_v1, %v652_v8  ;;  %v659_v16 = vmax.f32 %v567_v2, %v651_v9 }
 0x132   : > { %v2778_v18 = vpack.c.bf16 %v658_v11, %v654_v10  ;;  %v661_v19 = vmax.f32 %v644_v7, %v653_v12  ;;  %v1145_v10 = vpop.permute.xlu1 %1144 }
 0x133   : > { %v2782_v20 = vpack.c.bf16 %v660_v15, %v656_v13  ;;  %v2776_v21 = vpack.c.bf16 %v659_v16, %v655_v14 }
 0x134   : > { %v2780_v22 = vpack.c.bf16 %v661_v19, %v657_v17 }
 0x135   : > { %2777 = vmatprep.subr.bf16.mxu0 %v2776_v21 }
 0x136   : > { %2781 = vmatprep.subr.bf16.mxu1 %v2780_v22  ;;  %2779 = vmatpush1.bf16.msra.mxu0 %v2778_v18 }
 0x137   : > { %2783 = vmatpush1.bf16.msra.mxu1 %v2782_v20  ;;  %2785 = vmatprep.subr.bf16.mxu0 %v2776_v21 }
 0x138   : > { %2789 = vmatprep.subr.bf16.mxu1 %v2780_v22 }
 0x139   : > { %2580 = vmatmul.mubr.msk.f32.vlgmr.msra.gmra.mrb[4].mxu0 %vm293_vm0, %v662_v23 }
 0x13a   : > { %2581 = vmatmul.mubr.msk.f32.vlgmr.msra.gmra.mrb[4].mxu1 %vm293_vm0, %v662_v23  ;;  %2787 = vmatpush1.bf16.msra.mxu0 %v2778_v18 }
 0x13b   : > { %2791 = vmatpush1.bf16.msra.mxu1 %v2782_v20  ;;  %891 = vmatprep.mubr.f32.mxu0 %v2849_v4 }
 0x13c   : > { %962 = vmatprep.mubr.f32.mxu1 %v2849_v4 }
 0x13d   : > { %2582 = vmatmul.mubr.msk.f32.vlgmr.msra.gmra.mrb[6].mxu0 %vm293_vm0, %v823_v24 }
 0x13e   : > { %2583 = vmatmul.mubr.msk.f32.vlgmr.msra.gmra.mrb[6].mxu1 %vm293_vm0, %v823_v24  ;;  %1037 = vmatprep.mubr.f32.mxu0 %v2849_v4 }
 0x13f   : > { %1108 = vmatprep.mubr.f32.mxu1 %v2849_v4 }
 0x20c   : > { %v738_v26 = vpop.f32.mrb[4].mxu0 }
 0x20d   : > { %v739_v27 = vadd.f32 %v738_v26, %v667_v25  ;;  %v809_v28 = vpop.f32.mrb[4].mxu1  ;;  %v740_v29 = vpop.f32.mrb[5].mxu0 }
 0x20e   : > { %v810_v30 = vadd.f32 %v809_v28, %v667_v25  ;;  %v741_v31 = vadd.f32 %v740_v29, %v667_v25  ;;  %v811_v32 = vpop.f32.mrb[5].mxu1 }
 0x20f   : > { %v814_v33 = vmul.f32 0.01, %v739_v27  ;;  %v812_v34 = vadd.f32 %v811_v32, %v667_v25 }
 0x210   : > { %v816_v35 = vmul.f32 0.01, %v810_v30  ;;  %v815_v36 = vmul.f32 0.01, %v741_v31 }
 0x211   : > { %v817_v37 = vmul.f32 0.01, %v812_v34  ;;  %v818_v39 = vmax.f32 %v739_v27, %v814_v33 }
 0x212   : > { %v819_v38 = vmax.f32 %v741_v31, %v815_v36  ;;  %v820_v42 = vmax.f32 %v810_v30, %v816_v35 }
 0x213   : > { %v821_v40 = vmax.f32 %v812_v34, %v817_v37 }
 0x214   : > { %973 = vmatprep.subr.mxu0 %v819_v38 }
 0x215   : > { %1044 = vmatprep.subr.mxu1 %v821_v40  ;;  %974 = vmatpush1.msra.mxu0 %v818_v39  ;;  %v1323_v39 = vld [vmem:[%s3474_s1 + $0x38] sm:$0xff]  ;;  %v1324_v40 = vld [vmem:[%s3474_s1 + $0x40] sm:$0xff] }
 0x216   : > { %1045 = vmatpush1.msra.mxu1 %v820_v42  ;;  %2584 = vmatmul.mubr.msk.f32.vlgmr.msra.gmra.mrb[6].mxu0 %vm969_vm2, %v822_v41  ;;  %v1686_v42 = vld [vmem:[%s3474_s1 + $0x70] sm:$0xff] }
 0x217   : > { %2585 = vmatmul.mubr.msk.f32.vlgmr.msra.gmra.mrb[6].mxu1 %vm969_vm2, %v822_v41  ;;  %1217 = vmatprep.mubr.f32.mxu0 %v2849_v4  ;;  %v1685_v41 = vld [vmem:[%s3474_s1 + $0x68] sm:$0xff] }
 0x218   : > { %1294 = vmatprep.mubr.f32.mxu1 %v2849_v4 }
 0x2e9   : > { %v1039_v0 = vpop.f32.mrb[6].mxu0 }
 0x2ea   : > { %v1121_v44 = vadd.f32 %v1119_v43, %v1039_v0  ;;  %v1110_v45 = vpop.f32.mrb[6].mxu1  ;;  %v1041_v46 = vpop.f32.mrb[7].mxu0 }
 0x2eb   : > { %v1123_v47 = vadd.f32 %v1119_v43, %v1110_v45  ;;  %v1122_v48 = vadd.f32 %v1119_v43, %v1041_v46  ;;  %v1112_v49 = vpop.f32.mrb[7].mxu1 }
 0x2ec   : > { %v1125_v50 = vmul.f32 0.01, %v1121_v44  ;;  %v1124_v51 = vadd.f32 %v1119_v43, %v1112_v49  ;;  %v1652_v43 = vpop.permute.xlu0 %1651 }
 0x2ed   : > { %v1127_v52 = vmul.f32 0.01, %v1123_v47  ;;  %v1126_v53 = vmul.f32 0.01, %v1122_v48 }
 0x2ee   : > { %v3098_v54 = vmax.f32 %v1121_v44, %v1125_v50  ;;  %v1128_v55 = vmul.f32 0.01, %v1124_v51 }
 0x2ef   : > { %v3100_v56 = vmax.f32 %v1122_v48, %v1126_v53  ;;  %v3108_v59 = vmax.f32 %v1123_v47, %v1127_v52 }
 0x2f0   : > { %v3102_v57 = vmax.f32 %v1124_v51, %v1128_v55  ;;  %2219 = vxpose.xlu0.b32.start.end [1/1] (short) %v3098_v54, 128  ;;  %v1657_v51 = vpop.permute.xlu1 %1656 }
 0x2f1   : > { %2251 = vxpose.xlu1.b32.start.end [1/1] (short) %v3100_v56, 128  ;;  %1153 = vmatprep.subr.mxu0 %v3100_v56 }
 0x2f2   : > { %1230 = vmatprep.subr.mxu1 %v3102_v57  ;;  %1154 = vmatpush1.msra.mxu0 %v3098_v54 }
 0x2f3   : > { %1231 = vmatpush1.msra.mxu1 %v3108_v59  ;;  %2586 = vmatmul.mubr.msk.f32.vlgmr.msra.gmra.mrb[8].mxu0 %vm969_vm2, %v1133_v58 }
 0x2f4   : > { %2588 = vmatmul.mubr.msk.f32.vlgmr.msra.gmra.mrb[8].mxu1 %vm969_vm2, %v1133_v58  ;;  %1333 = vmatprep.subr.mxu0 %v3100_v56 }
 0x2f5   : > { %1410 = vmatprep.subr.mxu1 %v3102_v57  ;;  %1334 = vmatpush1.msra.mxu0 %v3098_v54 }
 0x2f6   : > { %1411 = vmatpush1.msra.mxu1 %v3108_v59  ;;  %1223 = vmatprep.mubr.f32.mxu0 %v2849_v4 }
 0x2f7   : > { %1300 = vmatprep.mubr.f32.mxu1 %v2849_v4  ;;  %2587 = vmatmul.mubr.msk.f32.gmra.mrb[10].mxu0 %vm969_vm2, %v1134_v60 }
 0x2f8   : > { %2589 = vmatmul.mubr.msk.f32.gmra.mrb[10].mxu1 %vm969_vm2, %v1134_v60  ;;  %1397 = vmatprep.mubr.f32.mxu0 %v2849_v4 }
 0x2f9   : > { %1474 = vmatprep.mubr.f32.mxu1 %v2849_v4 }
 0x2fb   : > { %2590 = vmatmul.mubr.msk.f32.vlgmr.msra.gmra.mrb[12].mxu0 %vm969_vm2, %v1325_v61 }
 0x2fc   : > { %2592 = vmatmul.mubr.msk.f32.vlgmr.msra.gmra.mrb[12].mxu1 %vm969_vm2, %v1325_v61  ;;  %1403 = vmatprep.mubr.f32.mxu0 %v2849_v4 }
 0x2fd   : > { %1480 = vmatprep.mubr.f32.mxu1 %v2849_v4 }
 0x2ff   : > { %2591 = vmatmul.mubr.msk.f32.gmra.mrb[14].mxu0 %vm969_vm2, %v1326_v62 }
 0x300   : > { %2593 = vmatmul.mubr.msk.f32.gmra.mrb[14].mxu1 %vm969_vm2, %v1326_v62  ;;  %1557 = vmatprep.mubr.f32.mxu0 %v2849_v4 }
 0x301   : > { %1634 = vmatprep.mubr.f32.mxu1 %v2849_v4 }
 0x3c6   : > { %v1219_v1 = vpop.f32.mrb[8].mxu0 }
 0x3c7   : > { %v1220_v2 = vadd.f32 %v1219_v1, %v1140_v63  ;;  %v1296_v3 = vpop.f32.mrb[8].mxu1  ;;  %v1221_v5 = vpop.f32.mrb[9].mxu0 }
 0x3c8   : > { %v1297_v6 = vadd.f32 %v1296_v3, %v1140_v63  ;;  %v1222_v7 = vadd.f32 %v1221_v5, %v1140_v63  ;;  %v1298_v8 = vpop.f32.mrb[9].mxu1 }
 0x3c9   : > { %v1299_v9 = vadd.f32 %v1298_v8, %v1140_v63  ;;  %v1307_v12 = vmul.f32 0.01, %v1220_v2 }
 0x3ca   : > { %v1225_v11 = vpop.f32.mrb[10].mxu0  ;;  %v1309_v16 = vmul.f32 0.01, %v1297_v6  ;;  %v1308_v17 = vmul.f32 0.01, %v1222_v7 }
 0x3cb   : > { %v1226_v13 = vadd.f32 %v1225_v11, %v1145_v10  ;;  %v1302_v14 = vpop.f32.mrb[10].mxu1  ;;  %v1227_v15 = vpop.f32.mrb[11].mxu0  ;;  %v1310_v21 = vmul.f32 0.01, %v1299_v9  ;;  %v1315_v26 = vmax.f32 %v1220_v2, %v1307_v12 }
 0x3cc   : > { %v1303_v18 = vadd.f32 %v1302_v14, %v1145_v10  ;;  %v1228_v19 = vadd.f32 %v1227_v15, %v1145_v10  ;;  %v1304_v20 = vpop.f32.mrb[11].mxu1  ;;  %v1317_v29 = vmax.f32 %v1297_v6, %v1309_v16  ;;  %v1316_v30 = vmax.f32 %v1222_v7, %v1308_v17 }
 0x3cd   : > { %v1311_v22 = vmul.f32 0.01, %v1226_v13  ;;  %v1305_v23 = vadd.f32 %v1304_v20, %v1145_v10  ;;  %v1318_v33 = vmax.f32 %v1299_v9, %v1310_v21  ;;  %v1683_v20 = vld [vmem:[%s3474_s1 + $0x58] sm:$0xff]  ;;  %v1684_v21 = vld [vmem:[%s3474_s1 + $0x60] sm:$0xff] }
 0x3ce   : > { %v1313_v24 = vmul.f32 0.01, %v1303_v18  ;;  %v1312_v25 = vmul.f32 0.01, %v1228_v19 }
 0x3cf   : > { %v1319_v27 = vmax.f32 %v1226_v13, %v1311_v22  ;;  %v1314_v28 = vmul.f32 0.01, %v1305_v23  ;;  %v3188_v22 = vpop.permute.xlu0 %2011 }
 0x3d0   : > { %v1321_v31 = vmax.f32 %v1303_v18, %v1313_v24  ;;  %v1320_v32 = vmax.f32 %v1228_v19, %v1312_v25 }
 0x3d1   : > { %v2794_v34 = vpack.c.bf16 %v1319_v27, %v1315_v26  ;;  %v1322_v35 = vmax.f32 %v1305_v23, %v1314_v28  ;;  %v3190_v23 = vpop.permute.xlu1 %2016 }
 0x3d2   : > { %v2798_v36 = vpack.c.bf16 %v1321_v31, %v1317_v29  ;;  %v2792_v37 = vpack.c.bf16 %v1320_v32, %v1316_v30 }
 0x3d3   : > { %v2796_v38 = vpack.c.bf16 %v1322_v35, %v1318_v33 }
 0x3d4   : > { %2793 = vmatprep.subr.bf16.mxu0 %v2792_v37 }
 0x3d5   : > { %2797 = vmatprep.subr.bf16.mxu1 %v2796_v38  ;;  %2795 = vmatpush1.bf16.msra.mxu0 %v2794_v34  ;;  %v2267_v24 = vpop.trf.xlu1 }
 0x3d6   : > { %2799 = vmatpush1.bf16.msra.mxu1 %v2798_v36  ;;  %1693 = vmatprep.subr.mxu0 %v3100_v56  ;;  %2363 = vst.msk [vmem:[%s3196_s26 + $0x80] sm:$0xff] %vm969_vm2, %v2267_v24 }
 0x3d7   : > { %1770 = vmatprep.subr.mxu1 %v3102_v57 }
 0x3d8   : > { %2594 = vmatmul.mubr.msk.f32.vlgmr.msra.gmra.mrb[12].mxu0 %vm293_vm0, %v1323_v39 }
 0x3d9   : > { %2596 = vmatmul.mubr.msk.f32.vlgmr.msra.gmra.mrb[12].mxu1 %vm293_vm0, %v1323_v39  ;;  %1694 = vmatpush1.msra.mxu0 %v3098_v54  ;;  %v2268_v26 = vpop.trf.xlu1 }
 0x3da   : > { %1771 = vmatpush1.msra.mxu1 %v3108_v59  ;;  %1563 = vmatprep.mubr.f32.mxu0 %v2849_v4  ;;  %2364 = vst.msk [vmem:[%s3196_s26 + $0x88] sm:$0xff] %vm969_vm2, %v2268_v26 }
 0x3db   : > { %1640 = vmatprep.mubr.f32.mxu1 %v2849_v4 }
 0x3dc   : > { %2595 = vmatmul.mubr.msk.f32.gmra.mrb[14].mxu0 %vm293_vm0, %v1324_v40 }
 0x3dd   : > { %2597 = vmatmul.mubr.msk.f32.gmra.mrb[14].mxu1 %vm293_vm0, %v1324_v40  ;;  %1757 = vmatprep.mubr.f32.mxu0 %v2849_v4  ;;  %v2269_v28 = vpop.trf.xlu1 }
 0x3de   : > { %1834 = vmatprep.mubr.f32.mxu1 %v2849_v4  ;;  %2365 = vst.msk [vmem:[%s3196_s26 + $0x90] sm:$0xff] %vm969_vm2, %v2269_v28 }
 0x3e0   : > { %2598 = vmatmul.mubr.msk.f32.vlgmr.msra.gmra.mrb[16].mxu0 %vm969_vm2, %v1685_v41 }
 0x3e1   : > { %2600 = vmatmul.mubr.msk.f32.vlgmr.msra.gmra.mrb[16].mxu1 %vm969_vm2, %v1685_v41  ;;  %1763 = vmatprep.mubr.f32.mxu0 %v2849_v4  ;;  %v2270_v30 = vpop.trf.xlu1 }
 0x3e2   : > { %1840 = vmatprep.mubr.f32.mxu1 %v2849_v4  ;;  %2366 = vst.msk [vmem:[%s3196_s26 + $0x98] sm:$0xff] %vm969_vm2, %v2270_v30 }
 0x3e4   : > { %2599 = vmatmul.mubr.msk.f32.gmra.mrb[18].mxu0 %vm969_vm2, %v1686_v42 }
 0x3e5   : > { %2601 = vmatmul.mubr.msk.f32.gmra.mrb[18].mxu1 %vm969_vm2, %v1686_v42  ;;  %1917 = vmatprep.mubr.f32.mxu0 %v2849_v4  ;;  %v2271_v32 = vpop.trf.xlu1 }
 0x3e6   : > { %1994 = vmatprep.mubr.f32.mxu1 %v2849_v4  ;;  %2367 = vst.msk [vmem:[%s3196_s26 + $0xa0] sm:$0xff] %vm969_vm2, %v2271_v32 }
 0x3e9   : > { %v2272_v34 = vpop.trf.xlu1 }
 0x3ea   : > { %2368 = vst.msk [vmem:[%s3196_s26 + $0xa8] sm:$0xff] %vm969_vm2, %v2272_v34 }
 0x3ed   : > { %v2273_v36 = vpop.trf.xlu1 }
 0x3ee   : > { %2369 = vst.msk [vmem:[%s3196_s26 + $0xb0] sm:$0xff] %vm969_vm2, %v2273_v36 }
 0x3f1   : > { %v2274_v38 = vpop.trf.xlu1 }
 0x3f2   : > { %2370 = vst.msk [vmem:[%s3196_s26 + $0xb8] sm:$0xff] %vm969_vm2, %v2274_v38 }
 0x3f5   : > { %v2275_v40 = vpop.trf.xlu1 }
 0x3f6   : > { %2371 = vst.msk [vmem:[%s3196_s26 + $0xc0] sm:$0xff] %vm969_vm2, %v2275_v40 }
 0x3f9   : > { %v2276_v42 = vpop.trf.xlu1 }
 0x3fa   : > { %2372 = vst.msk [vmem:[%s3196_s26 + $0xc8] sm:$0xff] %vm969_vm2, %v2276_v42 }
 0x4ab   : > { %v1559_v0 = vpop.f32.mrb[12].mxu0 }
 0x4ac   : > { %v1659_v44 = vadd.f32 %v1652_v43, %v1559_v0  ;;  %v1636_v45 = vpop.f32.mrb[12].mxu1  ;;  %v1561_v46 = vpop.f32.mrb[13].mxu0 }
 0x4ad   : > { %v1661_v47 = vadd.f32 %v1652_v43, %v1636_v45  ;;  %v1660_v48 = vadd.f32 %v1652_v43, %v1561_v46  ;;  %v1638_v49 = vpop.f32.mrb[13].mxu1  ;;  %v2277_v0 = vpop.trf.xlu1 }
 0x4ae   : > { %v1662_v50 = vadd.f32 %v1652_v43, %v1638_v49  ;;  %v1667_v53 = vmul.f32 0.01, %v1659_v44  ;;  %2373 = vst.msk [vmem:[%s3196_s26 + $0xd0] sm:$0xff] %vm969_vm2, %v2277_v0 }
 0x4af   : > { %v1565_v52 = vpop.f32.mrb[14].mxu0  ;;  %v1669_v58 = vmul.f32 0.01, %v1661_v47  ;;  %v1668_v60 = vmul.f32 0.01, %v1660_v48 }
 0x4b0   : > { %v1663_v54 = vadd.f32 %v1657_v51, %v1565_v52  ;;  %v1642_v55 = vpop.f32.mrb[14].mxu1  ;;  %v1567_v56 = vpop.f32.mrb[15].mxu0  ;;  %v1670_v1 = vmul.f32 0.01, %v1662_v50  ;;  %v1675_v7 = vmax.f32 %v1659_v44, %v1667_v53 }
 0x4b1   : > { %v1665_v61 = vadd.f32 %v1657_v51, %v1642_v55  ;;  %v1664_v62 = vadd.f32 %v1657_v51, %v1567_v56  ;;  %v1644_v63 = vpop.f32.mrb[15].mxu1  ;;  %v1677_v10 = vmax.f32 %v1661_v47, %v1669_v58  ;;  %v1676_v11 = vmax.f32 %v1660_v48, %v1668_v60  ;;  %v2278_v45 = vpop.trf.xlu1 }
 0x4b2   : > { %v1671_v2 = vmul.f32 0.01, %v1663_v54  ;;  %v1666_v3 = vadd.f32 %v1657_v51, %v1644_v63  ;;  %v1678_v14 = vmax.f32 %v1662_v50, %v1670_v1  ;;  %2374 = vst.msk [vmem:[%s3196_s26 + $0xd8] sm:$0xff] %vm969_vm2, %v2278_v45 }
 0x4b3   : > { %v1673_v5 = vmul.f32 0.01, %v1665_v61  ;;  %v1672_v6 = vmul.f32 0.01, %v1664_v62 }
 0x4b4   : > { %v1679_v8 = vmax.f32 %v1663_v54, %v1671_v2  ;;  %v1674_v9 = vmul.f32 0.01, %v1666_v3 }
 0x4b5   : > { %v1681_v12 = vmax.f32 %v1665_v61, %v1673_v5  ;;  %v1680_v13 = vmax.f32 %v1664_v62, %v1672_v6  ;;  %v2279_v47 = vpop.trf.xlu1 }
 0x4b6   : > { %v2802_v15 = vpack.c.bf16 %v1679_v8, %v1675_v7  ;;  %v1682_v16 = vmax.f32 %v1666_v3, %v1674_v9  ;;  %2375 = vst.msk [vmem:[%s3196_s26 + $0xe0] sm:$0xff] %vm969_vm2, %v2279_v47 }
 0x4b7   : > { %v2806_v17 = vpack.c.bf16 %v1681_v12, %v1677_v10  ;;  %v2800_v18 = vpack.c.bf16 %v1680_v13, %v1676_v11 }
 0x4b8   : > { %v2804_v19 = vpack.c.bf16 %v1682_v16, %v1678_v14 }
 0x4b9   : > { %2801 = vmatprep.subr.bf16.mxu0 %v2800_v18  ;;  %v2280_v49 = vpop.trf.xlu1 }
 0x4ba   : > { %2805 = vmatprep.subr.bf16.mxu1 %v2804_v19  ;;  %2803 = vmatpush1.bf16.msra.mxu0 %v2802_v15  ;;  %2376 = vst.msk [vmem:[%s3196_s26 + $0xe8] sm:$0xff] %vm969_vm2, %v2280_v49 }
 0x4bb   : > { %2807 = vmatpush1.bf16.msra.mxu1 %v2806_v17 }
 0x4bd   : > { %2602 = vmatmul.mubr.msk.f32.vlgmr.msra.gmra.mrb[16].mxu0 %vm293_vm0, %v1683_v20  ;;  %v2281_v51 = vpop.trf.xlu1 }
 0x4be   : > { %2604 = vmatmul.mubr.msk.f32.vlgmr.msra.gmra.mrb[16].mxu1 %vm293_vm0, %v1683_v20  ;;  %1923 = vmatprep.mubr.f32.mxu0 %v2849_v4  ;;  %2377 = vst.msk [vmem:[%s3196_s26 + $0xf0] sm:$0xff] %vm969_vm2, %v2281_v51 }
 0x4bf   : > { %2000 = vmatprep.mubr.f32.mxu1 %v2849_v4  ;;  %v2235_v4 = vpop.trf.xlu0 }
 0x4c0   : > { %2347 = vst.msk [vmem:[%s3196_s26] sm:$0xff] %vm969_vm2, %v2235_v4 }
 0x4c1   : > { %2603 = vmatmul.mubr.msk.f32.gmra.mrb[18].mxu0 %vm293_vm0, %v1684_v21  ;;  %v2282_v62 = vpop.trf.xlu1 }
 0x4c2   : > { %2605 = vmatmul.mubr.msk.f32.gmra.mrb[18].mxu1 %vm293_vm0, %v1684_v21  ;;  %2378 = vst.msk [vmem:[%s3196_s26 + $0xf8] sm:$0xff] %vm969_vm2, %v2282_v62 }
 0x4c3   : > { %v2236_v25 = vpop.trf.xlu0 }
 0x4c4   : > { %2348 = vst.msk [vmem:[%s3196_s26 + $0x8] sm:$0xff] %vm969_vm2, %v2236_v25 }
 0x4c7   : > { %v2237_v27 = vpop.trf.xlu0 }
 0x4c8   : > { %2349 = vst.msk [vmem:[%s3196_s26 + $0x10] sm:$0xff] %vm969_vm2, %v2237_v27 }
 0x4cb   : > { %v2238_v29 = vpop.trf.xlu0 }
 0x4cc   : > { %2350 = vst.msk [vmem:[%s3196_s26 + $0x18] sm:$0xff] %vm969_vm2, %v2238_v29 }
 0x4cf   : > { %v2239_v31 = vpop.trf.xlu0 }
 0x4d0   : > { %2351 = vst.msk [vmem:[%s3196_s26 + $0x20] sm:$0xff] %vm969_vm2, %v2239_v31 }
 0x4d3   : > { %v2240_v33 = vpop.trf.xlu0 }
 0x4d4   : > { %2352 = vst.msk [vmem:[%s3196_s26 + $0x28] sm:$0xff] %vm969_vm2, %v2240_v33 }
 0x4d7   : > { %v2241_v35 = vpop.trf.xlu0 }
 0x4d8   : > { %2353 = vst.msk [vmem:[%s3196_s26 + $0x30] sm:$0xff] %vm969_vm2, %v2241_v35 }
 0x4db   : > { %v2242_v37 = vpop.trf.xlu0 }
 0x4dc   : > { %2354 = vst.msk [vmem:[%s3196_s26 + $0x38] sm:$0xff] %vm969_vm2, %v2242_v37 }
 0x4df   : > { %v2243_v39 = vpop.trf.xlu0 }
 0x4e0   : > { %2355 = vst.msk [vmem:[%s3196_s26 + $0x40] sm:$0xff] %vm969_vm2, %v2243_v39 }
 0x4e3   : > { %v2244_v41 = vpop.trf.xlu0 }
 0x4e4   : > { %2356 = vst.msk [vmem:[%s3196_s26 + $0x48] sm:$0xff] %vm969_vm2, %v2244_v41 }
 0x4e7   : > { %v2245_v43 = vpop.trf.xlu0 }
 0x4e8   : > { %2357 = vst.msk [vmem:[%s3196_s26 + $0x50] sm:$0xff] %vm969_vm2, %v2245_v43 }
 0x4eb   : > { %v2246_v44 = vpop.trf.xlu0 }
 0x4ec   : > { %2358 = vst.msk [vmem:[%s3196_s26 + $0x58] sm:$0xff] %vm969_vm2, %v2246_v44 }
 0x4ef   : > { %v2247_v46 = vpop.trf.xlu0 }
 0x4f0   : > { %2359 = vst.msk [vmem:[%s3196_s26 + $0x60] sm:$0xff] %vm969_vm2, %v2247_v46 }
 0x4f3   : > { %v2248_v48 = vpop.trf.xlu0 }
 0x4f4   : > { %2360 = vst.msk [vmem:[%s3196_s26 + $0x68] sm:$0xff] %vm969_vm2, %v2248_v48 }
 0x4f7   : > { %v2249_v50 = vpop.trf.xlu0 }
 0x4f8   : > { %2361 = vst.msk [vmem:[%s3196_s26 + $0x70] sm:$0xff] %vm969_vm2, %v2249_v50 }
 0x4fb   : > { %v2250_v53 = vpop.trf.xlu0 }
 0x4fc   : > { %2362 = vst.msk [vmem:[%s3196_s26 + $0x78] sm:$0xff] %vm969_vm2, %v2250_v53 }
 0x590   : > { %v1919_v52 = vpop.f32.mrb[16].mxu0 }
 0x591   : > { %v2019_v54 = vadd.f32 %v3188_v22, %v1919_v52  ;;  %v1996_v55 = vpop.f32.mrb[16].mxu1  ;;  %v1921_v56 = vpop.f32.mrb[17].mxu0 }
 0x592   : > { %v2021_v58 = vadd.f32 %v3188_v22, %v1996_v55  ;;  %v2020_v60 = vadd.f32 %v3188_v22, %v1921_v56  ;;  %v1998_v61 = vpop.f32.mrb[17].mxu1 }
 0x593   : > { %v2022_v63 = vadd.f32 %v3188_v22, %v1998_v61  ;;  %2027 = vxpose.xlu0.b32.start [1/2] (short) %v2019_v54, 128 }
 0x594   : > { %2059 = vxpose.xlu1.b32.start [1/2] (short) %v2020_v60, 128  ;;  %v1925_v1 = vpop.f32.mrb[18].mxu0 }
 0x595   : > { %v2002_v2 = vpop.f32.mrb[18].mxu1  ;;  %v2023_v3 = vadd.f32 %v3190_v23, %v1925_v1  ;;  %v1927_v5 = vpop.f32.mrb[19].mxu0 }
 0x596   : > { %v2024_v6 = vadd.f32 %v3190_v23, %v1927_v5  ;;  %v2004_v7 = vpop.f32.mrb[19].mxu1  ;;  %v2025_v8 = vadd.f32 %v3190_v23, %v2002_v2 }
 0x597   : > { %2028 = vxpose.xlu0.b32.end [2/2] (short) %v2023_v3, 128  ;;  %v2026_v9 = vadd.f32 %v3190_v23, %v2004_v7 }
 0x598   : > { %2060 = vxpose.xlu1.b32.end [2/2] (short) %v2024_v6, 128 }
 0x5d0   : > { %2091 = vxpose.xlu0.b32.start [1/2] (short) %v2021_v58, 128 }
 0x5d1   : > { %2123 = vxpose.xlu1.b32.start [1/2] (short) %v2022_v63, 128 }
 0x5d4   : > { %2092 = vxpose.xlu0.b32.end [2/2] (short) %v2025_v8, 128 }
 0x5d5   : > { %2124 = vxpose.xlu1.b32.end [2/2] (short) %v2026_v9, 128 }
 0x60d   : > { %2283 = vxpose.xlu0.b32.start.end [1/1] (short) %v3108_v59, 128 }
 0x60e   : > { %2315 = vxpose.xlu1.b32.start.end [1/1] (short) %v3102_v57, 128 }
 0x613   : > { %v2043_v10 = vpop.trf.xlu0 }
 0x614   : > { %2155 = vst.msk [vmem:[%s3276_s29] sm:$0xff] %vm293_vm0, %v2043_v10  ;;  %v2075_v59 = vpop.trf.xlu1 }
 0x615   : > { %2171 = vst.msk [vmem:[%s3276_s29 + $0x80] sm:$0xff] %vm293_vm0, %v2075_v59 }
 0x617   : > { %v2044_v57 = vpop.trf.xlu0 }
 0x618   : > { %2156 = vst.msk [vmem:[%s3276_s29 + $0x8] sm:$0xff] %vm293_vm0, %v2044_v57  ;;  %v2076_v11 = vpop.trf.xlu1 }
 0x619   : > { %2172 = vst.msk [vmem:[%s3276_s29 + $0x88] sm:$0xff] %vm293_vm0, %v2076_v11 }
 0x61b   : > { %v2045_v12 = vpop.trf.xlu0 }
 0x61c   : > { %2157 = vst.msk [vmem:[%s3276_s29 + $0x10] sm:$0xff] %vm293_vm0, %v2045_v12  ;;  %v2077_v13 = vpop.trf.xlu1 }
 0x61d   : > { %2173 = vst.msk [vmem:[%s3276_s29 + $0x90] sm:$0xff] %vm293_vm0, %v2077_v13 }
 0x61f   : > { %v2046_v14 = vpop.trf.xlu0 }
 0x620   : > { %2158 = vst.msk [vmem:[%s3276_s29 + $0x18] sm:$0xff] %vm293_vm0, %v2046_v14  ;;  %v2078_v15 = vpop.trf.xlu1 }
 0x621   : > { %2174 = vst.msk [vmem:[%s3276_s29 + $0x98] sm:$0xff] %vm293_vm0, %v2078_v15 }
 0x623   : > { %v2047_v16 = vpop.trf.xlu0 }
 0x624   : > { %2159 = vst.msk [vmem:[%s3276_s29 + $0x20] sm:$0xff] %vm293_vm0, %v2047_v16  ;;  %v2079_v17 = vpop.trf.xlu1 }
 0x625   : > { %2175 = vst.msk [vmem:[%s3276_s29 + $0xa0] sm:$0xff] %vm293_vm0, %v2079_v17 }
 0x627   : > { %v2048_v18 = vpop.trf.xlu0 }
 0x628   : > { %2160 = vst.msk [vmem:[%s3276_s29 + $0x28] sm:$0xff] %vm293_vm0, %v2048_v18  ;;  %v2080_v19 = vpop.trf.xlu1 }
 0x629   : > { %2176 = vst.msk [vmem:[%s3276_s29 + $0xa8] sm:$0xff] %vm293_vm0, %v2080_v19 }
 0x62b   : > { %v2049_v20 = vpop.trf.xlu0 }
 0x62c   : > { %2161 = vst.msk [vmem:[%s3276_s29 + $0x30] sm:$0xff] %vm293_vm0, %v2049_v20  ;;  %v2081_v21 = vpop.trf.xlu1 }
 0x62d   : > { %2177 = vst.msk [vmem:[%s3276_s29 + $0xb0] sm:$0xff] %vm293_vm0, %v2081_v21 }
 0x62f   : > { %v2050_v22 = vpop.trf.xlu0 }
 0x630   : > { %2162 = vst.msk [vmem:[%s3276_s29 + $0x38] sm:$0xff] %vm293_vm0, %v2050_v22  ;;  %v2082_v23 = vpop.trf.xlu1 }
 0x631   : > { %2178 = vst.msk [vmem:[%s3276_s29 + $0xb8] sm:$0xff] %vm293_vm0, %v2082_v23 }
 0x633   : > { %v2051_v4 = vpop.trf.xlu0 }
 0x634   : > { %2163 = vst.msk [vmem:[%s3276_s29 + $0x40] sm:$0xff] %vm293_vm0, %v2051_v4  ;;  %v2083_v24 = vpop.trf.xlu1 }
 0x635   : > { %2179 = vst.msk [vmem:[%s3276_s29 + $0xc0] sm:$0xff] %vm293_vm0, %v2083_v24 }
 0x637   : > { %v2052_v25 = vpop.trf.xlu0 }
 0x638   : > { %2164 = vst.msk [vmem:[%s3276_s29 + $0x48] sm:$0xff] %vm293_vm0, %v2052_v25  ;;  %v2084_v26 = vpop.trf.xlu1 }
 0x639   : > { %2180 = vst.msk [vmem:[%s3276_s29 + $0xc8] sm:$0xff] %vm293_vm0, %v2084_v26 }
 0x63b   : > { %v2053_v27 = vpop.trf.xlu0 }
 0x63c   : > { %2165 = vst.msk [vmem:[%s3276_s29 + $0x50] sm:$0xff] %vm293_vm0, %v2053_v27  ;;  %v2085_v28 = vpop.trf.xlu1 }
 0x63d   : > { %2181 = vst.msk [vmem:[%s3276_s29 + $0xd0] sm:$0xff] %vm293_vm0, %v2085_v28 }
 0x63f   : > { %v2054_v29 = vpop.trf.xlu0 }
 0x640   : > { %2166 = vst.msk [vmem:[%s3276_s29 + $0x58] sm:$0xff] %vm293_vm0, %v2054_v29  ;;  %v2086_v30 = vpop.trf.xlu1 }
 0x641   : > { %2182 = vst.msk [vmem:[%s3276_s29 + $0xd8] sm:$0xff] %vm293_vm0, %v2086_v30 }
 0x643   : > { %v2055_v31 = vpop.trf.xlu0 }
 0x644   : > { %2167 = vst.msk [vmem:[%s3276_s29 + $0x60] sm:$0xff] %vm293_vm0, %v2055_v31  ;;  %v2087_v32 = vpop.trf.xlu1 }
 0x645   : > { %2183 = vst.msk [vmem:[%s3276_s29 + $0xe0] sm:$0xff] %vm293_vm0, %v2087_v32 }
 0x647   : > { %v2056_v33 = vpop.trf.xlu0 }
 0x648   : > { %2168 = vst.msk [vmem:[%s3276_s29 + $0x68] sm:$0xff] %vm293_vm0, %v2056_v33  ;;  %v2088_v34 = vpop.trf.xlu1 }
 0x649   : > { %2184 = vst.msk [vmem:[%s3276_s29 + $0xe8] sm:$0xff] %vm293_vm0, %v2088_v34 }
 0x64b   : > { %v2057_v35 = vpop.trf.xlu0 }
 0x64c   : > { %2169 = vst.msk [vmem:[%s3276_s29 + $0x70] sm:$0xff] %vm293_vm0, %v2057_v35  ;;  %v2089_v36 = vpop.trf.xlu1 }
 0x64d   : > { %2185 = vst.msk [vmem:[%s3276_s29 + $0xf0] sm:$0xff] %vm293_vm0, %v2089_v36 }
 0x64f   : > { %v2058_v37 = vpop.trf.xlu0 }
 0x650   : > { %2170 = vst.msk [vmem:[%s3276_s29 + $0x78] sm:$0xff] %vm293_vm0, %v2058_v37  ;;  %v2090_v38 = vpop.trf.xlu1 }
 0x651   : > { %2186 = vst.msk [vmem:[%s3276_s29 + $0xf8] sm:$0xff] %vm293_vm0, %v2090_v38 }
 0x653   : > { %v2107_v39 = vpop.trf.xlu0 }
 0x654   : > { %2187 = vst.msk [vmem:[%s3276_s29 + $0x100] sm:$0xff] %vm293_vm0, %v2107_v39  ;;  %v2139_v40 = vpop.trf.xlu1 }
 0x655   : > { %2203 = vst.msk [vmem:[%s3276_s29 + $0x180] sm:$0xff] %vm293_vm0, %v2139_v40 }
 0x657   : > { %v2108_v41 = vpop.trf.xlu0 }
 0x658   : > { %2188 = vst.msk [vmem:[%s3276_s29 + $0x108] sm:$0xff] %vm293_vm0, %v2108_v41  ;;  %v2140_v42 = vpop.trf.xlu1 }
 0x659   : > { %2204 = vst.msk [vmem:[%s3276_s29 + $0x188] sm:$0xff] %vm293_vm0, %v2140_v42 }
 0x65b   : > { %v2109_v43 = vpop.trf.xlu0 }
 0x65c   : > { %2189 = vst.msk [vmem:[%s3276_s29 + $0x110] sm:$0xff] %vm293_vm0, %v2109_v43  ;;  %v2141_v0 = vpop.trf.xlu1 }
 0x65d   : > { %2205 = vst.msk [vmem:[%s3276_s29 + $0x190] sm:$0xff] %vm293_vm0, %v2141_v0 }
 0x65f   : > { %v2110_v44 = vpop.trf.xlu0 }
 0x660   : > { %2190 = vst.msk [vmem:[%s3276_s29 + $0x118] sm:$0xff] %vm293_vm0, %v2110_v44  ;;  %v2142_v45 = vpop.trf.xlu1 }
 0x661   : > { %2206 = vst.msk [vmem:[%s3276_s29 + $0x198] sm:$0xff] %vm293_vm0, %v2142_v45 }
 0x663   : > { %v2111_v46 = vpop.trf.xlu0 }
 0x664   : > { %2191 = vst.msk [vmem:[%s3276_s29 + $0x120] sm:$0xff] %vm293_vm0, %v2111_v46  ;;  %v2143_v47 = vpop.trf.xlu1 }
 0x665   : > { %2207 = vst.msk [vmem:[%s3276_s29 + $0x1a0] sm:$0xff] %vm293_vm0, %v2143_v47 }
 0x667   : > { %v2112_v48 = vpop.trf.xlu0 }
 0x668   : > { %2192 = vst.msk [vmem:[%s3276_s29 + $0x128] sm:$0xff] %vm293_vm0, %v2112_v48  ;;  %v2144_v49 = vpop.trf.xlu1 }
 0x669   : > { %2208 = vst.msk [vmem:[%s3276_s29 + $0x1a8] sm:$0xff] %vm293_vm0, %v2144_v49 }
 0x66b   : > { %v2113_v50 = vpop.trf.xlu0 }
 0x66c   : > { %2193 = vst.msk [vmem:[%s3276_s29 + $0x130] sm:$0xff] %vm293_vm0, %v2113_v50  ;;  %v2145_v51 = vpop.trf.xlu1 }
 0x66d   : > { %2209 = vst.msk [vmem:[%s3276_s29 + $0x1b0] sm:$0xff] %vm293_vm0, %v2145_v51 }
 0x66f   : > { %v2114_v52 = vpop.trf.xlu0 }
 0x670   : > { %2194 = vst.msk [vmem:[%s3276_s29 + $0x138] sm:$0xff] %vm293_vm0, %v2114_v52  ;;  %v2146_v53 = vpop.trf.xlu1 }
 0x671   : > { %2210 = vst.msk [vmem:[%s3276_s29 + $0x1b8] sm:$0xff] %vm293_vm0, %v2146_v53 }
 0x673   : > { %v2115_v54 = vpop.trf.xlu0 }
 0x674   : > { %2195 = vst.msk [vmem:[%s3276_s29 + $0x140] sm:$0xff] %vm293_vm0, %v2115_v54  ;;  %v2147_v55 = vpop.trf.xlu1 }
 0x675   : > { %2211 = vst.msk [vmem:[%s3276_s29 + $0x1c0] sm:$0xff] %vm293_vm0, %v2147_v55 }
 0x677   : > { %v2116_v56 = vpop.trf.xlu0 }
 0x678   : > { %2196 = vst.msk [vmem:[%s3276_s29 + $0x148] sm:$0xff] %vm293_vm0, %v2116_v56  ;;  %v2148_v58 = vpop.trf.xlu1 }
 0x679   : > { %2212 = vst.msk [vmem:[%s3276_s29 + $0x1c8] sm:$0xff] %vm293_vm0, %v2148_v58 }
 0x67b   : > { %v2117_v60 = vpop.trf.xlu0 }
 0x67c   : > { %2197 = vst.msk [vmem:[%s3276_s29 + $0x150] sm:$0xff] %vm293_vm0, %v2117_v60  ;;  %v2149_v61 = vpop.trf.xlu1 }
 0x67d   : > { %2213 = vst.msk [vmem:[%s3276_s29 + $0x1d0] sm:$0xff] %vm293_vm0, %v2149_v61 }
 0x67f   : > { %v2118_v62 = vpop.trf.xlu0 }
 0x680   : > { %2198 = vst.msk [vmem:[%s3276_s29 + $0x158] sm:$0xff] %vm293_vm0, %v2118_v62  ;;  %v2150_v63 = vpop.trf.xlu1 }
 0x681   : > { %2214 = vst.msk [vmem:[%s3276_s29 + $0x1d8] sm:$0xff] %vm293_vm0, %v2150_v63 }
 0x683   : > { %v2119_v1 = vpop.trf.xlu0 }
 0x684   : > { %2199 = vst.msk [vmem:[%s3276_s29 + $0x160] sm:$0xff] %vm293_vm0, %v2119_v1  ;;  %v2151_v2 = vpop.trf.xlu1 }
 0x685   : > { %2215 = vst.msk [vmem:[%s3276_s29 + $0x1e0] sm:$0xff] %vm293_vm0, %v2151_v2 }
 0x687   : > { %v2120_v3 = vpop.trf.xlu0 }
 0x688   : > { %2200 = vst.msk [vmem:[%s3276_s29 + $0x168] sm:$0xff] %vm293_vm0, %v2120_v3  ;;  %v2152_v5 = vpop.trf.xlu1 }
 0x689   : > { %2216 = vst.msk [vmem:[%s3276_s29 + $0x1e8] sm:$0xff] %vm293_vm0, %v2152_v5 }
 0x68b   : > { %v2121_v6 = vpop.trf.xlu0 }
 0x68c   : > { %2201 = vst.msk [vmem:[%s3276_s29 + $0x170] sm:$0xff] %vm293_vm0, %v2121_v6  ;;  %v2153_v7 = vpop.trf.xlu1 }
 0x68d   : > { %2217 = vst.msk [vmem:[%s3276_s29 + $0x1f0] sm:$0xff] %vm293_vm0, %v2153_v7 }
 0x68f   : > { %v2122_v8 = vpop.trf.xlu0 }
 0x690   : > { %2202 = vst.msk [vmem:[%s3276_s29 + $0x178] sm:$0xff] %vm293_vm0, %v2122_v8  ;;  %v2154_v9 = vpop.trf.xlu1 }
 0x691   : > { %2218 = vst.msk [vmem:[%s3276_s29 + $0x1f8] sm:$0xff] %vm293_vm0, %v2154_v9 }
 0x693   : > { %v2299_v10 = vpop.trf.xlu0 }
 0x694   : > { %2379 = vst.msk [vmem:[%s3196_s26 + $0x100] sm:$0xff] %vm969_vm2, %v2299_v10  ;;  %v2331_v59 = vpop.trf.xlu1 }
 0x695   : > { %2395 = vst.msk [vmem:[%s3196_s26 + $0x180] sm:$0xff] %vm969_vm2, %v2331_v59 }
 0x697   : > { %v2300_v57 = vpop.trf.xlu0 }
 0x698   : > { %2380 = vst.msk [vmem:[%s3196_s26 + $0x108] sm:$0xff] %vm969_vm2, %v2300_v57  ;;  %v2332_v11 = vpop.trf.xlu1 }
 0x699   : > { %2396 = vst.msk [vmem:[%s3196_s26 + $0x188] sm:$0xff] %vm969_vm2, %v2332_v11 }
 0x69b   : > { %v2301_v12 = vpop.trf.xlu0 }
 0x69c   : > { %2381 = vst.msk [vmem:[%s3196_s26 + $0x110] sm:$0xff] %vm969_vm2, %v2301_v12  ;;  %v2333_v13 = vpop.trf.xlu1 }
 0x69d   : > { %2397 = vst.msk [vmem:[%s3196_s26 + $0x190] sm:$0xff] %vm969_vm2, %v2333_v13 }
 0x69f   : > { %v2302_v14 = vpop.trf.xlu0 }
 0x6a0   : > { %2382 = vst.msk [vmem:[%s3196_s26 + $0x118] sm:$0xff] %vm969_vm2, %v2302_v14  ;;  %v2334_v15 = vpop.trf.xlu1 }
 0x6a1   : > { %2398 = vst.msk [vmem:[%s3196_s26 + $0x198] sm:$0xff] %vm969_vm2, %v2334_v15 }
 0x6a3   : > { %v2303_v16 = vpop.trf.xlu0 }
 0x6a4   : > { %2383 = vst.msk [vmem:[%s3196_s26 + $0x120] sm:$0xff] %vm969_vm2, %v2303_v16  ;;  %v2335_v17 = vpop.trf.xlu1 }
 0x6a5   : > { %2399 = vst.msk [vmem:[%s3196_s26 + $0x1a0] sm:$0xff] %vm969_vm2, %v2335_v17 }
 0x6a7   : > { %v2304_v18 = vpop.trf.xlu0 }
 0x6a8   : > { %2384 = vst.msk [vmem:[%s3196_s26 + $0x128] sm:$0xff] %vm969_vm2, %v2304_v18  ;;  %v2336_v19 = vpop.trf.xlu1 }
 0x6a9   : > { %2400 = vst.msk [vmem:[%s3196_s26 + $0x1a8] sm:$0xff] %vm969_vm2, %v2336_v19 }
 0x6ab   : > { %v2305_v20 = vpop.trf.xlu0 }
 0x6ac   : > { %2385 = vst.msk [vmem:[%s3196_s26 + $0x130] sm:$0xff] %vm969_vm2, %v2305_v20  ;;  %v2337_v21 = vpop.trf.xlu1 }
 0x6ad   : > { %2401 = vst.msk [vmem:[%s3196_s26 + $0x1b0] sm:$0xff] %vm969_vm2, %v2337_v21 }
 0x6af   : > { %v2306_v22 = vpop.trf.xlu0 }
 0x6b0   : > { %2386 = vst.msk [vmem:[%s3196_s26 + $0x138] sm:$0xff] %vm969_vm2, %v2306_v22  ;;  %v2338_v23 = vpop.trf.xlu1 }
 0x6b1   : > { %2402 = vst.msk [vmem:[%s3196_s26 + $0x1b8] sm:$0xff] %vm969_vm2, %v2338_v23 }
 0x6b3   : > { %v2307_v4 = vpop.trf.xlu0 }
 0x6b4   : > { %2387 = vst.msk [vmem:[%s3196_s26 + $0x140] sm:$0xff] %vm969_vm2, %v2307_v4  ;;  %v2339_v24 = vpop.trf.xlu1 }
 0x6b5   : > { %2403 = vst.msk [vmem:[%s3196_s26 + $0x1c0] sm:$0xff] %vm969_vm2, %v2339_v24 }
 0x6b7   : > { %v2308_v25 = vpop.trf.xlu0 }
 0x6b8   : > { %2388 = vst.msk [vmem:[%s3196_s26 + $0x148] sm:$0xff] %vm969_vm2, %v2308_v25  ;;  %v2340_v26 = vpop.trf.xlu1 }
 0x6b9   : > { %2404 = vst.msk [vmem:[%s3196_s26 + $0x1c8] sm:$0xff] %vm969_vm2, %v2340_v26 }
 0x6bb   : > { %v2309_v27 = vpop.trf.xlu0 }
 0x6bc   : > { %2389 = vst.msk [vmem:[%s3196_s26 + $0x150] sm:$0xff] %vm969_vm2, %v2309_v27  ;;  %v2341_v28 = vpop.trf.xlu1 }
 0x6bd   : > { %2405 = vst.msk [vmem:[%s3196_s26 + $0x1d0] sm:$0xff] %vm969_vm2, %v2341_v28 }
 0x6bf   : > { %v2310_v29 = vpop.trf.xlu0 }
 0x6c0   : > { %2390 = vst.msk [vmem:[%s3196_s26 + $0x158] sm:$0xff] %vm969_vm2, %v2310_v29  ;;  %v2342_v30 = vpop.trf.xlu1 }
 0x6c1   : > { %2406 = vst.msk [vmem:[%s3196_s26 + $0x1d8] sm:$0xff] %vm969_vm2, %v2342_v30 }
 0x6c3   : > { %v2311_v31 = vpop.trf.xlu0 }
 0x6c4   : > { %2391 = vst.msk [vmem:[%s3196_s26 + $0x160] sm:$0xff] %vm969_vm2, %v2311_v31  ;;  %v2343_v32 = vpop.trf.xlu1 }
 0x6c5   : > { %2407 = vst.msk [vmem:[%s3196_s26 + $0x1e0] sm:$0xff] %vm969_vm2, %v2343_v32 }
 0x6c7   : > { %v2312_v33 = vpop.trf.xlu0 }
 0x6c8   : > { %2392 = vst.msk [vmem:[%s3196_s26 + $0x168] sm:$0xff] %vm969_vm2, %v2312_v33  ;;  %v2344_v34 = vpop.trf.xlu1 }
 0x6c9   : > { %2408 = vst.msk [vmem:[%s3196_s26 + $0x1e8] sm:$0xff] %vm969_vm2, %v2344_v34 }
 0x6cb   : > { %v2313_v35 = vpop.trf.xlu0 }
 0x6cc   : > { %2393 = vst.msk [vmem:[%s3196_s26 + $0x170] sm:$0xff] %vm969_vm2, %v2313_v35  ;;  %v2345_v36 = vpop.trf.xlu1 }
 0x6cd   : > { %2409 = vst.msk [vmem:[%s3196_s26 + $0x1f0] sm:$0xff] %vm969_vm2, %v2345_v36 }
 0x6cf   : > { %v2314_v37 = vpop.trf.xlu0 }
 0x6d0   : > { %2394 = vst.msk [vmem:[%s3196_s26 + $0x178] sm:$0xff] %vm969_vm2, %v2314_v37  ;;  %v2346_v38 = vpop.trf.xlu1 }
 0x6d1   : > { %2410 = vst.msk [vmem:[%s3196_s26 + $0x1f8] sm:$0xff] %vm969_vm2, %v2346_v38 }
 0x6d2 PF: > { %s15_s15 = sadd.s32 1, %s2846_s15  }
 0x6d3   : > { %p12_p4 = scmp.ge.s32.totalorder %s15_s15, 4  }
 0x6d5   :  { %14 = sbr.rel (!%p12_p4) target bundleno = 1 (0x1), region = 74 }

</bundles_post_ra>
